<compile_context>
chip_gen: v6e
topology: v6e:2x2x1
jax: 0.10.0
libtpu: 0.0.40
codegen_flags: <defaults>
</compile_context>

<pallas_src>
import functools

import jax
import jax.numpy as jnp
from jax.experimental import pallas as pl
from jax.experimental.pallas import tpu as pltpu


# ---------------------------------------------------------------------------
# in-kernel helpers (traced into the kernel body)
# ---------------------------------------------------------------------------
def _lrelu(x):
    return jnp.where(x > 0, x, 0.2 * x)


def _conv1d_k3_fused(x, w_cat, b, seg_len):
    """Conv1d(k=3, stride=1, pad=1) on lane-concatenated samples.

    x:     (Cin, N) activations; each sample occupies `seg_len` consecutive lanes.
    w_cat: (Cout, 3*Cin) = [W(t-1) | W(t) | W(t+1)]  (taps concatenated host-side)
    b:     (Cout, 1) float32 bias, added once after the fused matmul.

    The +-1 time shifts are XLU lane rotations (pltpu.roll); the rotation
    wrap / cross-sample positions are zeroed so each sample sees zero padding
    at its own edges. The whole conv is then a single deep MXU matmul.
    """
    _, n = x.shape
    pos = jax.lax.broadcasted_iota(jnp.int32, (1, n), 1) % seg_len
    x_prev = jnp.where(pos == 0, 0.0, pltpu.roll(x, shift=1, axis=1))             # x[t-1]
    x_next = jnp.where(pos == seg_len - 1, 0.0, pltpu.roll(x, shift=n - 1, axis=1))  # x[t+1]
    x_cat = jnp.concatenate([x_prev, x, x_next], axis=0)                          # (3*Cin, N)
    y = jnp.dot(w_cat, x_cat, preferred_element_type=jnp.float32)
    return y + b


# ---------------------------------------------------------------------------
# Pallas kernel: full UpBlock forward for one lane-concatenated batch tile
# ---------------------------------------------------------------------------
def upblock_kernel(x_ref, w1_ref, b1_ref, wr1_ref, br1_ref, wr2_ref, br2_ref,
                   u1_ref, u2_ref, o_ref, *, seg_len):
    cdt = w1_ref.dtype                                   # compute dtype (f32 or bf16)
    x = x_ref[...]                                       # (nf, bt*L)

    # conv1 (nf -> nc) + LeakyReLU(0.2)
    h = _lrelu(_conv1d_k3_fused(x, w1_ref[...], b1_ref[...], seg_len))
    # linear x2 upsample (align_corners=False) as one MXU matmul
    h = jnp.dot(h.astype(cdt), u1_ref[...], preferred_element_type=jnp.float32)   # (nc, bt*2L)
    # ResidualDenseBlock (dense=False, use_norm=False): conv -> conv -> lrelu
    h = _conv1d_k3_fused(h.astype(cdt), wr1_ref[...], br1_ref[...], 2 * seg_len)
    h = _lrelu(_conv1d_k3_fused(h.astype(cdt), wr2_ref[...], br2_ref[...], 2 * seg_len))
    # second linear x2 upsample
    h = jnp.dot(h.astype(cdt), u2_ref[...], preferred_element_type=jnp.float32)   # (nc, bt*4L)

    o_ref[...] = h.astype(o_ref.dtype)


# ---------------------------------------------------------------------------
# host-side precomputation + pallas_call wrapper
# ---------------------------------------------------------------------------
def _upsample_matrix_x2(L, dtype=jnp.float32):
    """U (L, 2L): x @ U == F.interpolate(x, scale_factor=2, mode='linear',
    align_corners=False) along the last axis (including the edge clamp)."""
    j = jnp.arange(2 * L, dtype=jnp.float32)
    src = jnp.maximum((j + 0.5) * 0.5 - 0.5, 0.0)
    i0 = jnp.floor(src).astype(jnp.int32)
    w = src - i0.astype(jnp.float32)
    i1 = jnp.minimum(i0 + 1, L - 1)
    rows = jnp.arange(L)[:, None]
    mat = (jnp.where(rows == i0[None, :], 1.0 - w[None, :], 0.0)
           + jnp.where(rows == i1[None, :], w[None, :], 0.0))
    return mat.astype(dtype)


def upblock_forward(x, params, *, batch_tile=None, compute_dtype=jnp.float32):
    B, nf, L = x.shape
    nc = params["w1_cat"].shape[0]
    bt = B if batch_tile is None else batch_tile
    assert B % bt == 0, "batch must divide evenly into batch tiles"
    n0 = bt * L
    # Lane-dense layout: keep the concatenated time axis a multiple of 128 so
    # every store is an unmasked vst and the lane rotations are tile-aligned.
    assert n0 % 128 == 0, (
        f"batch_tile * L = {n0} must be a multiple of 128; pick L/batch_tile accordingly")
    assert nf % 8 == 0 and nc % 8 == 0, "channel counts must be multiples of 8"

    cdt = compute_dtype
    # lane-concatenate the batch: sample b occupies lanes [b*L, (b+1)*L)
    xl = jnp.transpose(x, (1, 0, 2)).reshape(nf, B * L).astype(cdt)

    # Block-diagonal (per-sample) x2 linear-upsample matrices, built once on
    # the host and kept VMEM-resident across grid steps (constant index_map).
    eye = jnp.eye(bt, dtype=jnp.float32)
    u1 = jnp.kron(eye, _upsample_matrix_x2(L)).astype(cdt)         # (bt*L,  bt*2L)
    u2 = jnp.kron(eye, _upsample_matrix_x2(2 * L)).astype(cdt)     # (bt*2L, bt*4L)

    w1 = params["w1_cat"].astype(cdt)
    wr1 = params["wr1_cat"].astype(cdt)
    wr2 = params["wr2_cat"].astype(cdt)

    const = lambda shape: pl.BlockSpec(shape, lambda i: (0, 0))
    kernel = functools.partial(upblock_kernel, seg_len=L)

    out_l = pl.pallas_call(
        kernel,
        out_shape=jax.ShapeDtypeStruct((nc, B * 4 * L), jnp.float32),
        grid=(B // bt,),
        in_specs=[
            pl.BlockSpec((nf, n0), lambda i: (0, i)),      # activations (lane tile per step)
            const((nc, 3 * nf)), const((nc, 1)),           # conv1      W_cat / bias
            const((nc, 3 * nc)), const((nc, 1)),           # RDB conv1  W_cat / bias
            const((nc, 3 * nc)), const((nc, 1)),           # RDB conv2  W_cat / bias
            const((n0, 2 * n0)),                           # upsample #1 matrix
            const((2 * n0, 4 * n0)),                       # upsample #2 matrix
        ],
        out_specs=pl.BlockSpec((nc, 4 * n0), lambda i: (0, i)),
        compiler_params=pltpu.CompilerParams(
            dimension_semantics=("parallel",)),            # batch tiles are independent
    )(xl, w1, params["b1"], wr1, params["br1"], wr2, params["br2"], u1, u2)

    # back to PyTorch NCL layout
    return jnp.transpose(out_l.reshape(nc, B, 4 * L), (1, 0, 2))


# ---------------------------------------------------------------------------
# deterministic parameter init (kaiming_normal fan_in, a=0, scaled by 0.1;
# biases zeroed — mirrors the intent of initialize_weights in the module)
# ---------------------------------------------------------------------------
def init_params(key, nf, nc):
    k1, k2, k3 = jax.random.split(key, 3)

    def conv_w(k, cout, cin):
        std = (2.0 / (cin * 3)) ** 0.5
        return jax.random.normal(k, (cout, cin, 3), jnp.float32) * std * 0.1

    w1, wr1, wr2 = conv_w(k1, nc, nf), conv_w(k2, nc, nc), conv_w(k3, nc, nc)
    zeros = lambda c: jnp.zeros((c,), jnp.float32)
    # fused-tap layout: [W(t-1) | W(t) | W(t+1)]  -> (Cout, 3*Cin)
    cat = lambda w: jnp.concatenate([w[:, :, 0], w[:, :, 1], w[:, :, 2]], axis=1)
    return {
        "w1_cat": cat(w1), "b1": zeros(nc)[:, None],
        "wr1_cat": cat(wr1), "br1": zeros(nc)[:, None],
        "wr2_cat": cat(wr2), "br2": zeros(nc)[:, None],
        # PyTorch-layout copies for the pure-JAX reference
        "w1_oik": w1, "b1_vec": zeros(nc),
        "wr1_oik": wr1, "br1_vec": zeros(nc),
        "wr2_oik": wr2, "br2_vec": zeros(nc),
    }


# ---------------------------------------------------------------------------
# pure-JAX reference (correctness check only)
# ---------------------------------------------------------------------------
def _ref_interp2(x):
    B, C, L = x.shape
    j = jnp.arange(2 * L)
    src = jnp.maximum((j + 0.5) * 0.5 - 0.5, 0.0)
    i0 = jnp.floor(src).astype(jnp.int32)
    w = (src - i0)[None, None, :]
    i1 = jnp.minimum(i0 + 1, L - 1)
    return x[:, :, i0] * (1.0 - w) + x[:, :, i1] * w


def ref_forward(x, p):
    def conv(h, w, b):
        y = jax.lax.conv_general_dilated(
            h, w, window_strides=(1,), padding=[(1, 1)],
            dimension_numbers=("NCH", "OIH", "NCH"))
        return y + b[None, :, None]

    h = conv(x, p["w1_oik"], p["b1_vec"])
    h = jnp.where(h > 0, h, 0.2 * h)
    h = _ref_interp2(h)
    h = conv(h, p["wr1_oik"], p["br1_vec"])
    h = conv(h, p["wr2_oik"], p["br2_vec"])
    h = jnp.where(h > 0, h, 0.2 * h)
    h = _ref_interp2(h)
    return h


if __name__ == "__main__":
    # B*L = 128 so the lane-concatenated time axis is already lane-dense.
    B, nf, nc, L = 2, 64, 32, 64
    key = jax.random.PRNGKey(0)
    kx, kp = jax.random.split(key)
    x = jax.random.normal(kx, (B, nf, L), jnp.float32)
    params = init_params(kp, nf, nc)

    out = jax.block_until_ready(upblock_forward(x, params))
    ref = jax.block_until_ready(ref_forward(x, params))

    assert out.shape == (B, nc, 4 * L), out.shape
    if not jnp.allclose(out, ref, rtol=1e-4, atol=1e-5):
        raise AssertionError("Pallas UpBlock output mismatch vs JAX reference")

    print("KERNEL_OK")
</pallas_src>

<mosaic_0001>
module attributes {stable_mosaic.version = 11 : i64} {
  func.func @upblock_kernel(%arg0: i32, %arg1: memref<64x128xf32, #tpu.memory_space<vmem>>, %arg2: memref<32x192xf32, #tpu.memory_space<vmem>>, %arg3: memref<32x1xf32, #tpu.memory_space<vmem>>, %arg4: memref<32x96xf32, #tpu.memory_space<vmem>>, %arg5: memref<32x1xf32, #tpu.memory_space<vmem>>, %arg6: memref<32x96xf32, #tpu.memory_space<vmem>>, %arg7: memref<32x1xf32, #tpu.memory_space<vmem>>, %arg8: memref<128x256xf32, #tpu.memory_space<vmem>>, %arg9: memref<256x512xf32, #tpu.memory_space<vmem>>, %arg10: memref<32x512xf32, #tpu.memory_space<vmem>>) attributes {dimension_semantics = [#tpu.dimension_semantics<parallel>], iteration_bounds = array<i64: 1>, scalar_prefetch = 0 : i64, scratch_operands = 0 : i64, tpu.core_type = #tpu.core_type<tc>, window_params = [{transform_indices = @transform_0, window_bounds = array<i64: 64, 128>}, {pipeline_mode = #tpu.pipeline_mode<synchronous>, transform_indices = @transform_1, window_bounds = array<i64: 32, 192>}, {pipeline_mode = #tpu.pipeline_mode<synchronous>, transform_indices = @transform_2, window_bounds = array<i64: 32, 1>}, {pipeline_mode = #tpu.pipeline_mode<synchronous>, transform_indices = @transform_3, window_bounds = array<i64: 32, 96>}, {pipeline_mode = #tpu.pipeline_mode<synchronous>, transform_indices = @transform_4, window_bounds = array<i64: 32, 1>}, {pipeline_mode = #tpu.pipeline_mode<synchronous>, transform_indices = @transform_5, window_bounds = array<i64: 32, 96>}, {pipeline_mode = #tpu.pipeline_mode<synchronous>, transform_indices = @transform_6, window_bounds = array<i64: 32, 1>}, {pipeline_mode = #tpu.pipeline_mode<synchronous>, transform_indices = @transform_7, window_bounds = array<i64: 128, 256>}, {pipeline_mode = #tpu.pipeline_mode<synchronous>, transform_indices = @transform_8, window_bounds = array<i64: 256, 512>}, {transform_indices = @transform_9, window_bounds = array<i64: 32, 512>}]} {
    %c0 = arith.constant 0 : index
    %c0_0 = arith.constant 0 : index
    %0 = vector.load %arg1[%c0, %c0_0] : memref<64x128xf32, #tpu.memory_space<vmem>>, vector<64x128xf32>
    %c0_1 = arith.constant 0 : index
    %c0_2 = arith.constant 0 : index
    %1 = vector.load %arg2[%c0_1, %c0_2] : memref<32x192xf32, #tpu.memory_space<vmem>>, vector<32x192xf32>
    %c0_3 = arith.constant 0 : index
    %c0_4 = arith.constant 0 : index
    %2 = vector.load %arg3[%c0_3, %c0_4] : memref<32x1xf32, #tpu.memory_space<vmem>>, vector<32x1xf32>
    %3 = tpu.iota {dimensions = array<i32: 1>} : vector<1x128xi32>
    %c64_i32 = arith.constant 64 : i32
    %c0_i32 = arith.constant 0 : i32
    %4 = arith.cmpi eq, %c64_i32, %c0_i32 : i32
    %c1_i32 = arith.constant 1 : i32
    %5 = arith.select %4, %c1_i32, %c64_i32 : i32
    %6 = vector.broadcast %5 : i32 to vector<1x128xi32>
    %7 = arith.remsi %3, %6 : vector<1x128xi32>
    %c0_i32_5 = arith.constant 0 : i32
    %8 = vector.broadcast %c0_i32_5 : i32 to vector<1x128xi32>
    %9 = arith.cmpi ne, %7, %8 : vector<1x128xi32>
    %c0_i32_6 = arith.constant 0 : i32
    %10 = vector.broadcast %c0_i32_6 : i32 to vector<1x128xi32>
    %11 = arith.cmpi slt, %7, %10 : vector<1x128xi32>
    %c0_i32_7 = arith.constant 0 : i32
    %12 = arith.cmpi slt, %5, %c0_i32_7 : i32
    %13 = vector.broadcast %12 : i1 to vector<1x128xi1>
    %14 = vector.broadcast %13 : vector<1x128xi1> to vector<1x128xi1>
    %15 = arith.xori %11, %14 : vector<1x128xi1>
    %16 = arith.andi %15, %9 : vector<1x128xi1>
    %17 = vector.broadcast %5 : i32 to vector<1x128xi32>
    %18 = arith.addi %7, %17 : vector<1x128xi32>
    %19 = arith.select %16, %18, %7 : vector<1x128xi1>, vector<1x128xi32>
    %c0_i32_8 = arith.constant 0 : i32
    %20 = vector.broadcast %c0_i32_8 : i32 to vector<1x128xi32>
    %21 = arith.cmpi eq, %19, %20 : vector<1x128xi32>
    %c1_i32_9 = arith.constant 1 : i32
    %22 = tpu.dynamic_rotate %0 by %c1_i32_9 dim 1 : vector<64x128xf32>, i32 -> vector<64x128xf32>
    %cst = arith.constant 0.000000e+00 : f32
    %23 = vector.shape_cast %21 : vector<1x128xi1> to vector<1x128xi1>
    %24 = vector.broadcast %23 : vector<1x128xi1> to vector<64x128xi1>
    %25 = vector.broadcast %cst : f32 to vector<64x128xf32>
    %26 = arith.select %24, %25, %22 : vector<64x128xi1>, vector<64x128xf32>
    %c63_i32 = arith.constant 63 : i32
    %27 = vector.broadcast %c63_i32 : i32 to vector<1x128xi32>
    %28 = arith.cmpi eq, %19, %27 : vector<1x128xi32>
    %c127_i32 = arith.constant 127 : i32
    %29 = tpu.dynamic_rotate %0 by %c127_i32 dim 1 : vector<64x128xf32>, i32 -> vector<64x128xf32>
    %cst_10 = arith.constant 0.000000e+00 : f32
    %30 = vector.shape_cast %28 : vector<1x128xi1> to vector<1x128xi1>
    %31 = vector.broadcast %30 : vector<1x128xi1> to vector<64x128xi1>
    %32 = vector.broadcast %cst_10 : f32 to vector<64x128xf32>
    %33 = arith.select %31, %32, %29 : vector<64x128xi1>, vector<64x128xf32>
    %34 = tpu.concatenate %26, %0, %33 in 0 : vector<64x128xf32>, vector<64x128xf32>, vector<64x128xf32> -> vector<192x128xf32>
    %cst_11 = arith.constant dense<0.000000e+00> : vector<32x128xf32>
    %35 = tpu.matmul %1, %34, %cst_11 {dimension_numbers = #tpu.dot_dimension_numbers<[1], [0], [0], [1], [0, 0, 1, 1], [], []>} : vector<32x192xf32>, vector<192x128xf32>, vector<32x128xf32> -> vector<32x128xf32>
    %36 = vector.broadcast %2 : vector<32x1xf32> to vector<32x128xf32>
    %37 = arith.addf %35, %36 : vector<32x128xf32>
    %cst_12 = arith.constant 0.000000e+00 : f32
    %38 = vector.broadcast %cst_12 : f32 to vector<32x128xf32>
    %39 = arith.cmpf ogt, %37, %38 : vector<32x128xf32>
    %cst_13 = arith.constant 2.000000e-01 : f32
    %40 = vector.broadcast %cst_13 : f32 to vector<32x128xf32>
    %41 = arith.mulf %40, %37 : vector<32x128xf32>
    %42 = arith.select %39, %37, %41 : vector<32x128xi1>, vector<32x128xf32>
    %c0_14 = arith.constant 0 : index
    %c0_15 = arith.constant 0 : index
    %43 = vector.load %arg8[%c0_14, %c0_15] : memref<128x256xf32, #tpu.memory_space<vmem>>, vector<128x256xf32>
    %cst_16 = arith.constant dense<0.000000e+00> : vector<32x256xf32>
    %44 = tpu.matmul %42, %43, %cst_16 {dimension_numbers = #tpu.dot_dimension_numbers<[1], [0], [0], [1], [0, 0, 1, 1], [], []>} : vector<32x128xf32>, vector<128x256xf32>, vector<32x256xf32> -> vector<32x256xf32>
    %c0_17 = arith.constant 0 : index
    %c0_18 = arith.constant 0 : index
    %45 = vector.load %arg4[%c0_17, %c0_18] : memref<32x96xf32, #tpu.memory_space<vmem>>, vector<32x96xf32>
    %c0_19 = arith.constant 0 : index
    %c0_20 = arith.constant 0 : index
    %46 = vector.load %arg5[%c0_19, %c0_20] : memref<32x1xf32, #tpu.memory_space<vmem>>, vector<32x1xf32>
    %47 = tpu.iota {dimensions = array<i32: 1>} : vector<1x256xi32>
    %c128_i32 = arith.constant 128 : i32
    %c0_i32_21 = arith.constant 0 : i32
    %48 = arith.cmpi eq, %c128_i32, %c0_i32_21 : i32
    %c1_i32_22 = arith.constant 1 : i32
    %49 = arith.select %48, %c1_i32_22, %c128_i32 : i32
    %50 = vector.broadcast %49 : i32 to vector<1x256xi32>
    %51 = arith.remsi %47, %50 : vector<1x256xi32>
    %c0_i32_23 = arith.constant 0 : i32
    %52 = vector.broadcast %c0_i32_23 : i32 to vector<1x256xi32>
    %53 = arith.cmpi ne, %51, %52 : vector<1x256xi32>
    %c0_i32_24 = arith.constant 0 : i32
    %54 = vector.broadcast %c0_i32_24 : i32 to vector<1x256xi32>
    %55 = arith.cmpi slt, %51, %54 : vector<1x256xi32>
    %c0_i32_25 = arith.constant 0 : i32
    %56 = arith.cmpi slt, %49, %c0_i32_25 : i32
    %57 = vector.broadcast %56 : i1 to vector<1x256xi1>
    %58 = vector.broadcast %57 : vector<1x256xi1> to vector<1x256xi1>
    %59 = arith.xori %55, %58 : vector<1x256xi1>
    %60 = arith.andi %59, %53 : vector<1x256xi1>
    %61 = vector.broadcast %49 : i32 to vector<1x256xi32>
    %62 = arith.addi %51, %61 : vector<1x256xi32>
    %63 = arith.select %60, %62, %51 : vector<1x256xi1>, vector<1x256xi32>
    %c0_i32_26 = arith.constant 0 : i32
    %64 = vector.broadcast %c0_i32_26 : i32 to vector<1x256xi32>
    %65 = arith.cmpi eq, %63, %64 : vector<1x256xi32>
    %c1_i32_27 = arith.constant 1 : i32
    %66 = tpu.dynamic_rotate %44 by %c1_i32_27 dim 1 : vector<32x256xf32>, i32 -> vector<32x256xf32>
    %cst_28 = arith.constant 0.000000e+00 : f32
    %67 = vector.shape_cast %65 : vector<1x256xi1> to vector<1x256xi1>
    %68 = vector.broadcast %67 : vector<1x256xi1> to vector<32x256xi1>
    %69 = vector.broadcast %cst_28 : f32 to vector<32x256xf32>
    %70 = arith.select %68, %69, %66 : vector<32x256xi1>, vector<32x256xf32>
    %c127_i32_29 = arith.constant 127 : i32
    %71 = vector.broadcast %c127_i32_29 : i32 to vector<1x256xi32>
    %72 = arith.cmpi eq, %63, %71 : vector<1x256xi32>
    %c255_i32 = arith.constant 255 : i32
    %73 = tpu.dynamic_rotate %44 by %c255_i32 dim 1 : vector<32x256xf32>, i32 -> vector<32x256xf32>
    %cst_30 = arith.constant 0.000000e+00 : f32
    %74 = vector.shape_cast %72 : vector<1x256xi1> to vector<1x256xi1>
    %75 = vector.broadcast %74 : vector<1x256xi1> to vector<32x256xi1>
    %76 = vector.broadcast %cst_30 : f32 to vector<32x256xf32>
    %77 = arith.select %75, %76, %73 : vector<32x256xi1>, vector<32x256xf32>
    %78 = tpu.concatenate %70, %44, %77 in 0 : vector<32x256xf32>, vector<32x256xf32>, vector<32x256xf32> -> vector<96x256xf32>
    %cst_31 = arith.constant dense<0.000000e+00> : vector<32x256xf32>
    %79 = tpu.matmul %45, %78, %cst_31 {dimension_numbers = #tpu.dot_dimension_numbers<[1], [0], [0], [1], [0, 0, 1, 1], [], []>} : vector<32x96xf32>, vector<96x256xf32>, vector<32x256xf32> -> vector<32x256xf32>
    %80 = vector.broadcast %46 : vector<32x1xf32> to vector<32x256xf32>
    %81 = arith.addf %79, %80 : vector<32x256xf32>
    %c0_32 = arith.constant 0 : index
    %c0_33 = arith.constant 0 : index
    %82 = vector.load %arg6[%c0_32, %c0_33] : memref<32x96xf32, #tpu.memory_space<vmem>>, vector<32x96xf32>
    %c0_34 = arith.constant 0 : index
    %c0_35 = arith.constant 0 : index
    %83 = vector.load %arg7[%c0_34, %c0_35] : memref<32x1xf32, #tpu.memory_space<vmem>>, vector<32x1xf32>
    %84 = tpu.iota {dimensions = array<i32: 1>} : vector<1x256xi32>
    %c128_i32_36 = arith.constant 128 : i32
    %c0_i32_37 = arith.constant 0 : i32
    %85 = arith.cmpi eq, %c128_i32_36, %c0_i32_37 : i32
    %c1_i32_38 = arith.constant 1 : i32
    %86 = arith.select %85, %c1_i32_38, %c128_i32_36 : i32
    %87 = vector.broadcast %86 : i32 to vector<1x256xi32>
    %88 = arith.remsi %84, %87 : vector<1x256xi32>
    %c0_i32_39 = arith.constant 0 : i32
    %89 = vector.broadcast %c0_i32_39 : i32 to vector<1x256xi32>
    %90 = arith.cmpi ne, %88, %89 : vector<1x256xi32>
    %c0_i32_40 = arith.constant 0 : i32
    %91 = vector.broadcast %c0_i32_40 : i32 to vector<1x256xi32>
    %92 = arith.cmpi slt, %88, %91 : vector<1x256xi32>
    %c0_i32_41 = arith.constant 0 : i32
    %93 = arith.cmpi slt, %86, %c0_i32_41 : i32
    %94 = vector.broadcast %93 : i1 to vector<1x256xi1>
    %95 = vector.broadcast %94 : vector<1x256xi1> to vector<1x256xi1>
    %96 = arith.xori %92, %95 : vector<1x256xi1>
    %97 = arith.andi %96, %90 : vector<1x256xi1>
    %98 = vector.broadcast %86 : i32 to vector<1x256xi32>
    %99 = arith.addi %88, %98 : vector<1x256xi32>
    %100 = arith.select %97, %99, %88 : vector<1x256xi1>, vector<1x256xi32>
    %c0_i32_42 = arith.constant 0 : i32
    %101 = vector.broadcast %c0_i32_42 : i32 to vector<1x256xi32>
    %102 = arith.cmpi eq, %100, %101 : vector<1x256xi32>
    %c1_i32_43 = arith.constant 1 : i32
    %103 = tpu.dynamic_rotate %81 by %c1_i32_43 dim 1 : vector<32x256xf32>, i32 -> vector<32x256xf32>
    %cst_44 = arith.constant 0.000000e+00 : f32
    %104 = vector.shape_cast %102 : vector<1x256xi1> to vector<1x256xi1>
    %105 = vector.broadcast %104 : vector<1x256xi1> to vector<32x256xi1>
    %106 = vector.broadcast %cst_44 : f32 to vector<32x256xf32>
    %107 = arith.select %105, %106, %103 : vector<32x256xi1>, vector<32x256xf32>
    %c127_i32_45 = arith.constant 127 : i32
    %108 = vector.broadcast %c127_i32_45 : i32 to vector<1x256xi32>
    %109 = arith.cmpi eq, %100, %108 : vector<1x256xi32>
    %c255_i32_46 = arith.constant 255 : i32
    %110 = tpu.dynamic_rotate %81 by %c255_i32_46 dim 1 : vector<32x256xf32>, i32 -> vector<32x256xf32>
    %cst_47 = arith.constant 0.000000e+00 : f32
    %111 = vector.shape_cast %109 : vector<1x256xi1> to vector<1x256xi1>
    %112 = vector.broadcast %111 : vector<1x256xi1> to vector<32x256xi1>
    %113 = vector.broadcast %cst_47 : f32 to vector<32x256xf32>
    %114 = arith.select %112, %113, %110 : vector<32x256xi1>, vector<32x256xf32>
    %115 = tpu.concatenate %107, %81, %114 in 0 : vector<32x256xf32>, vector<32x256xf32>, vector<32x256xf32> -> vector<96x256xf32>
    %cst_48 = arith.constant dense<0.000000e+00> : vector<32x256xf32>
    %116 = tpu.matmul %82, %115, %cst_48 {dimension_numbers = #tpu.dot_dimension_numbers<[1], [0], [0], [1], [0, 0, 1, 1], [], []>} : vector<32x96xf32>, vector<96x256xf32>, vector<32x256xf32> -> vector<32x256xf32>
    %117 = vector.broadcast %83 : vector<32x1xf32> to vector<32x256xf32>
    %118 = arith.addf %116, %117 : vector<32x256xf32>
    %cst_49 = arith.constant 0.000000e+00 : f32
    %119 = vector.broadcast %cst_49 : f32 to vector<32x256xf32>
    %120 = arith.cmpf ogt, %118, %119 : vector<32x256xf32>
    %cst_50 = arith.constant 2.000000e-01 : f32
    %121 = vector.broadcast %cst_50 : f32 to vector<32x256xf32>
    %122 = arith.mulf %121, %118 : vector<32x256xf32>
    %123 = arith.select %120, %118, %122 : vector<32x256xi1>, vector<32x256xf32>
    %c0_51 = arith.constant 0 : index
    %c0_52 = arith.constant 0 : index
    %124 = vector.load %arg9[%c0_51, %c0_52] : memref<256x512xf32, #tpu.memory_space<vmem>>, vector<256x512xf32>
    %cst_53 = arith.constant dense<0.000000e+00> : vector<32x512xf32>
    %125 = tpu.matmul %123, %124, %cst_53 {dimension_numbers = #tpu.dot_dimension_numbers<[1], [0], [0], [1], [0, 0, 1, 1], [], []>} : vector<32x256xf32>, vector<256x512xf32>, vector<32x512xf32> -> vector<32x512xf32>
    %c0_54 = arith.constant 0 : index
    %c0_55 = arith.constant 0 : index
    %126 = vector.load %arg10[%c0_54, %c0_55] : memref<32x512xf32, #tpu.memory_space<vmem>>, vector<32x512xf32>
    tpu.vector_store %arg10[%c0_54, %c0_55], %125 {strides = array<i32>} : memref<32x512xf32, #tpu.memory_space<vmem>>, vector<32x512xf32>,
    return
  }
  func.func @transform_0(%arg0: i32) -> (i32, i32) {
    %c0_i32 = arith.constant 0 : i32
    %c0_i32_0 = arith.constant 0 : i32
    return %c0_i32, %arg0 : i32, i32
  }
  func.func @transform_1(%arg0: i32) -> (i32, i32) {
    %c0_i32 = arith.constant 0 : i32
    %c0_i32_0 = arith.constant 0 : i32
    %c0_i32_1 = arith.constant 0 : i32
    return %c0_i32, %c0_i32_0 : i32, i32
  }
  func.func @transform_2(%arg0: i32) -> (i32, i32) {
    %c0_i32 = arith.constant 0 : i32
    %c0_i32_0 = arith.constant 0 : i32
    %c0_i32_1 = arith.constant 0 : i32
    return %c0_i32, %c0_i32_0 : i32, i32
  }
  func.func @transform_3(%arg0: i32) -> (i32, i32) {
    %c0_i32 = arith.constant 0 : i32
    %c0_i32_0 = arith.constant 0 : i32
    %c0_i32_1 = arith.constant 0 : i32
    return %c0_i32, %c0_i32_0 : i32, i32
  }
  func.func @transform_4(%arg0: i32) -> (i32, i32) {
    %c0_i32 = arith.constant 0 : i32
    %c0_i32_0 = arith.constant 0 : i32
    %c0_i32_1 = arith.constant 0 : i32
    return %c0_i32, %c0_i32_0 : i32, i32
  }
  func.func @transform_5(%arg0: i32) -> (i32, i32) {
    %c0_i32 = arith.constant 0 : i32
    %c0_i32_0 = arith.constant 0 : i32
    %c0_i32_1 = arith.constant 0 : i32
    return %c0_i32, %c0_i32_0 : i32, i32
  }
  func.func @transform_6(%arg0: i32) -> (i32, i32) {
    %c0_i32 = arith.constant 0 : i32
    %c0_i32_0 = arith.constant 0 : i32
    %c0_i32_1 = arith.constant 0 : i32
    return %c0_i32, %c0_i32_0 : i32, i32
  }
  func.func @transform_7(%arg0: i32) -> (i32, i32) {
    %c0_i32 = arith.constant 0 : i32
    %c0_i32_0 = arith.constant 0 : i32
    %c0_i32_1 = arith.constant 0 : i32
    return %c0_i32, %c0_i32_0 : i32, i32
  }
  func.func @transform_8(%arg0: i32) -> (i32, i32) {
    %c0_i32 = arith.constant 0 : i32
    %c0_i32_0 = arith.constant 0 : i32
    %c0_i32_1 = arith.constant 0 : i32
    return %c0_i32, %c0_i32_0 : i32, i32
  }
  func.func @transform_9(%arg0: i32) -> (i32, i32) {
    %c0_i32 = arith.constant 0 : i32
    %c0_i32_0 = arith.constant 0 : i32
    return %c0_i32, %arg0 : i32, i32
  }
}

</mosaic_0001>

<bundles_post_ra>
// kernel: tpu_custom_call.1
= control target key start
LH: loop header
LB: loop body
LE: loop exit
PB: predicated region body
PF: predicated region fallthrough
CT: control target
= control target key end

     0   :  { %14 = vsyncpa [#allocation3], 0  ;;  %s1955_s0 = inlined_call_operand.vmem [shape: f32[64,128], index: 0, kind: input, shape index: {}]   ;;  %s1956_s1 = inlined_call_operand.hbm [shape: f32[32,192], index: 1, kind: input, shape index: {}]   ;;  %s1957_s2 = inlined_call_operand.vmem [shape: f32[32,1], index: 2, kind: input, shape index: {}]   ;;  %s1958_s3 = inlined_call_operand.vmem [shape: f32[32,96], index: 3, kind: input, shape index: {}]   ;;  %s1959_s4 = inlined_call_operand.vmem [shape: f32[32,1], index: 4, kind: input, shape index: {}]   ;;  %s1960_s5 = inlined_call_operand.hbm [shape: f32[32,96], index: 5, kind: input, shape index: {}]   ;;  %s1961_s6 = inlined_call_operand.vmem [shape: f32[32,1], index: 6, kind: input, shape index: {}]   ;;  %s1962_s7 = inlined_call_operand.hbm [shape: f32[128,256], index: 7, kind: input, shape index: {}]   ;;  %s1963_s8 = inlined_call_operand.hbm [shape: f32[256,512], index: 8, kind: input, shape index: {}]   ;;  %s1964_s9 = inlined_call_operand.hbm [shape: f32[32,512], index: 9, kind: output, shape index: {}]  }
   0x1   :  { %15 = vsyncpa [#allocation6], 0 }
   0x2   :  { %16 = vsyncpa [#allocation9], 0 }
   0x3   :  { %17 = vsyncpa [#allocation4], 0  ;;  %s1457_s30 = smov [#allocation5]  }
   0x4   :  { %s43_s10 = sshll.u32 %s1457_s30, 4  ;;  %s44_s10 = int_to_ptr.vmem [resolvable:$true] %s43_s10 }
   0x5   :  { %s1357_s11 = scalar_lea.vmem %s44_s10, 512  ;;  %p1362_p1 = scmp.lt.s32.totalorder %s44_s10, %s44_s10 }
   0x6   :  { %p1358_p0 = scmp.ne.s32.totalorder %s44_s10, %s1357_s11  ;;  %p1363_p2 = scmp.lt.s32.totalorder %s1357_s11, %s1357_s11 }
   0x8   :  { %p1364_p3 = por %p1363_p2, %p1362_p1 }
   0xa   :  { %p1365_p4 = pnand %p1364_p3, %p1358_p0 }
   0xc   :  { %1368 = shalt.err (!%p1365_p4)
}
   0xd   :  { %s1458_s12 = smov 128   ;;  %s1459_s13 = smov 8  }
   0xe   :  { %49 = dma.hbm_to_vmem [thread:$0]  %s1960_s5, 512, %s44_s10, [#allocation6], %s1458_s12, %s1458_s12, %s1459_s13  }
   0xf   :  { %s1460_s16 = smov [#allocation2]  }
  0x10   :  { %s25_s17 = sshll.u32 %s1460_s16, 4  ;;  %s26_s17 = int_to_ptr.vmem [resolvable:$true] %s25_s17 }
  0x11   :  { %s1377_s18 = scalar_lea.vmem %s26_s17, 1024  ;;  %p1382_p6 = scmp.lt.s32.totalorder %s26_s17, %s26_s17 }
  0x12   :  { %p1378_p5 = scmp.ne.s32.totalorder %s26_s17, %s1377_s18  ;;  %p1383_p7 = scmp.lt.s32.totalorder %s1377_s18, %s1377_s18 }
  0x14   :  { %p1384_p8 = por %p1383_p7, %p1382_p6 }
  0x16   :  { %p1385_p9 = pnand %p1384_p8, %p1378_p5 }
  0x18   :  { %1388 = shalt.err (!%p1385_p9)
}
  0x19   :  { %s1461_s19 = smov 256   ;;  %s1462_s20 = smov 16  }
  0x1a   :  { %31 = dma.hbm_to_vmem [thread:$0]  %s1956_s1, 1024, %s26_s17, [#allocation3], %s1461_s19, %s1461_s19, %s1462_s20  }
  0x1b   :  { %s1463_s23 = smov [#allocation7]   ;;  %s1464_s25 = smov [#allocation8]  }
  0x1c   :  { %s57_s24 = sshll.u32 %s1463_s23, 4  ;;  %s69_s5 = sshll.u32 %s1464_s25, 4  ;;  %s58_s24 = int_to_ptr.vmem [resolvable:$true] %s57_s24  ;;  %s70_s5 = int_to_ptr.vmem [resolvable:$true] %s69_s5 }
  0x1d   :  { %s1397_s26 = scalar_lea.vmem %s58_s24, 4096  ;;  %p1402_p11 = scmp.lt.s32.totalorder %s58_s24, %s58_s24 }
  0x1e   :  { %p1398_p10 = scmp.ne.s32.totalorder %s58_s24, %s1397_s26  ;;  %p1403_p12 = scmp.lt.s32.totalorder %s1397_s26, %s1397_s26 }
  0x20   :  { %p1404_p13 = por %p1403_p12, %p1402_p11 }
  0x22   :  { %p1405_p0 = pnand %p1404_p13, %p1398_p10 }
  0x24   :  { %1408 = shalt.err (!%p1405_p0)
}
  0x25   :  { %63 = dma.hbm_to_vmem [thread:$0]  %s1962_s7, 4096, %s58_s24, [#allocation6], %s1461_s19, %s1461_s19, %s1462_s20  }
  0x26   :  { %s1417_s29 = scalar_lea.vmem %s70_s5, 16384  ;;  %p1422_p2 = scmp.lt.s32.totalorder %s70_s5, %s70_s5 }
  0x27   :  { %p1418_p1 = scmp.ne.s32.totalorder %s70_s5, %s1417_s29  ;;  %p1423_p3 = scmp.lt.s32.totalorder %s1417_s29, %s1417_s29 }
  0x29   :  { %p1424_p4 = por %p1423_p3, %p1422_p2 }
  0x2b   :  { %p1425_p5 = pnand %p1424_p4, %p1418_p1 }
  0x2d   :  { %1428 = shalt.err (!%p1425_p5)
}
  0x2e   :  { %s1465_s1 = smov 512   ;;  %s1466_s30 = smov 32  }
  0x2f   :  { %75 = dma.hbm_to_vmem [thread:$0]  %s1963_s8, 16384, %s70_s5, [#allocation9], %s1465_s1, %s1465_s1, %s1466_s30  }
  0x30   :  { %1449 = dma.done.wait [#allocation3], 1024  }
  0x31   :  { %1450 = vsyncadd [#allocation3], 4294966272 }
  0x32   :  { %1451 = dma.done.wait [#allocation6], 4608  }
  0x33   :  { %1452 = vsyncadd [#allocation6], 4294962688 }
  0x34   :  { %1453 = dma.done.wait [#allocation9], 16384  }
  0x35   :  { %1454 = vsyncadd [#allocation9], 4294950912  ;;  %v1467_v0 = vmov 0.0   ;;  %v95_v1 = vld [vmem:[%s1955_s0 + $0x38] sm:$0xff]  ;;  %v93_v2 = vld [vmem:[%s1955_s0 + $0x28] sm:$0xff]  ;;  %s1468_s8 = smov 1   ;;  %v108_v42 = vlaneseq }
  0x36   :  { %209 = vmatprep.subr.mxu0 %v1467_v0  ;;  %402 = vmatprep.mubr.f32.mxu1 %v1467_v0  ;;  %v94_v3 = vld [vmem:[%s1955_s0 + $0x30] sm:$0xff]  ;;  %v92_v4 = vld [vmem:[%s1955_s0 + $0x20] sm:$0xff]  ;;  %v91_v5 = vld [vmem:[%s1955_s0 + $0x18] sm:$0xff]  ;;  %s1469_s26 = smov 127   ;;  %vm196_vm0 = vcmask 523264   ;;  %v1470_v12 = vmov 0  }
  0x37   :  { %137 = vrot.lane.b32.xlu0 %v95_v1, %s1468_s8  ;;  %133 = vrot.lane.b32.xlu1 %v93_v2, %s1468_s8  ;;  %v90_v6 = vld [vmem:[%s1955_s0 + $0x10] sm:$0xff]  ;;  %v89_v7 = vld [vmem:[%s1955_s0 + $0x8] sm:$0xff]  ;;  %v337_v13 = vld [vmem:[#allocation7 + $0xf8] sm:$0xff]  ;;  %v1600_v43 = vand.u32 127, %v108_v42  ;;  %vm558_vm13 = vcmask 785408  }
  0x38   :  { %210 = vmatpush1.msra.mxu0 %v95_v1  ;;  %v88_v8 = vld [vmem:[%s1955_s0] sm:$0xff]  ;;  %v97_v9 = vld [vmem:[#allocation2 + $0x8] sm:$0xff]  ;;  %1347 = vset.pattern.permute.xlu0 %v1470_v12  ;;  %v336_v14 = vld [vmem:[#allocation7 + $0xf0] sm:$0xff] }
  0x39   :  { %211 = vmatprep.subr.mxu0 %v1467_v0  ;;  %1250 = vmatprep.mubr.msk.f32.mxu0 %vm196_vm0, %v97_v9  ;;  %v104_v10 = vld [vmem:[%s1957_s2] sm:$0xff]  ;;  %v105_v11 = vld [vmem:[%s1957_s2 + $0x8] sm:$0xff]  ;;  %v107_v16 = vld [vmem:[%s1957_s2 + $0x18] sm:$0xff]  ;;  %v114_v44 = vand.u32 63, %v1600_v43  ;;  %vm517_vm8 = vcmp.lt.s32.totalorder %v1600_v43, 127  ;;  %vm1329_vm9 = vcmp.ne.s32.totalorder %v1600_v43, 127 }
  0x3a   :  { %212 = vmatpush1.msra.mxu0 %v94_v3  ;;  %1348 = vset.pattern.permute.xlu1 %v1470_v12  ;;  %v335_v15 = vld [vmem:[#allocation7 + $0xe8] sm:$0xff]  ;;  %v106_v17 = vld [vmem:[%s1957_s2 + $0x10] sm:$0xff]  ;;  %v334_v18 = vld [vmem:[#allocation7 + $0xe0] sm:$0xff]  ;;  %vm478_vm11 = vcmp.lt.s32.totalorder %v1600_v43, 1  ;;  %vm1331_vm12 = vcmp.ne.s32.totalorder %v1600_v43, 0 }
  0x3b   :  { %135 = vrot.lane.b32.xlu0 %v94_v3, %s1468_s8  ;;  %131 = vrot.lane.b32.xlu1 %v92_v4, %s1468_s8  ;;  %v333_v19 = vld [vmem:[#allocation7 + $0xd8] sm:$0xff]  ;;  %v332_v20 = vld [vmem:[#allocation7 + $0xd0] sm:$0xff]  ;;  %v331_v21 = vld [vmem:[#allocation7 + $0xc8] sm:$0xff]  ;;  %vm1603_vm1 = vcmp.ne.s32.totalorder %v114_v44, 0  ;;  %vm1628_vm2 = vcmp.ne.s32.totalorder %v114_v44, 63 }
  0x3c   :  { %213 = vmatprep.subr.mxu0 %v1467_v0  ;;  %338 = vmatprep.subr.mxu1 %v337_v13  ;;  %v330_v22 = vld [vmem:[#allocation7 + $0xc0] sm:$0xff]  ;;  %v329_v23 = vld [vmem:[#allocation7 + $0xb8] sm:$0xff]  ;;  %v328_v24 = vld [vmem:[#allocation7 + $0xb0] sm:$0xff] }
  0x3d   :  { %214 = vmatpush1.msra.mxu0 %v93_v2  ;;  %339 = vmatpush1.msra.mxu1 %v336_v14  ;;  %v327_v25 = vld [vmem:[#allocation7 + $0xa8] sm:$0xff]  ;;  %v326_v26 = vld [vmem:[#allocation7 + $0xa0] sm:$0xff]  ;;  %v325_v27 = vld [vmem:[#allocation7 + $0x98] sm:$0xff] }
  0x3e   :  { %215 = vmatprep.subr.mxu0 %v1467_v0  ;;  %340 = vmatprep.subr.mxu1 %v335_v15  ;;  %v324_v28 = vld [vmem:[#allocation7 + $0x90] sm:$0xff]  ;;  %v323_v29 = vld [vmem:[#allocation7 + $0x88] sm:$0xff]  ;;  %v322_v30 = vld [vmem:[#allocation7 + $0x80] sm:$0xff] }
  0x3f   :  { %129 = vrot.lane.b32.xlu0 %v91_v5, %s1468_s8  ;;  %127 = vrot.lane.b32.xlu1 %v90_v6, %s1468_s8  ;;  %v321_v31 = vld [vmem:[#allocation7 + $0x78] sm:$0xff]  ;;  %v320_v32 = vld [vmem:[#allocation7 + $0x70] sm:$0xff]  ;;  %v319_v33 = vld [vmem:[#allocation7 + $0x68] sm:$0xff] }
  0x40   :  { %216 = vmatpush1.msra.mxu0 %v92_v4  ;;  %341 = vmatpush1.msra.mxu1 %v334_v18  ;;  %v318_v34 = vld [vmem:[#allocation7 + $0x60] sm:$0xff]  ;;  %v317_v35 = vld [vmem:[#allocation7 + $0x58] sm:$0xff]  ;;  %v316_v36 = vld [vmem:[#allocation7 + $0x50] sm:$0xff] }
  0x41   :  { %217 = vmatprep.subr.mxu0 %v1467_v0  ;;  %342 = vmatprep.subr.mxu1 %v333_v19  ;;  %v315_v37 = vld [vmem:[#allocation7 + $0x48] sm:$0xff]  ;;  %v314_v38 = vld [vmem:[#allocation7 + $0x40] sm:$0xff]  ;;  %v313_v39 = vld [vmem:[#allocation7 + $0x38] sm:$0xff] }
  0x42   :  { %218 = vmatpush1.msra.mxu0 %v91_v5  ;;  %343 = vmatpush1.msra.mxu1 %v332_v20  ;;  %v312_v40 = vld [vmem:[#allocation7 + $0x30] sm:$0xff]  ;;  %v311_v41 = vld [vmem:[#allocation7 + $0x28] sm:$0xff]  ;;  %v96_v63 = vld [vmem:[#allocation2] sm:$0xff] }
  0x43   :  { %125 = vrot.lane.b32.xlu0 %v89_v7, %s1468_s8  ;;  %123 = vrot.lane.b32.xlu1 %v88_v8, %s1468_s8  ;;  %v308_v9 = vld [vmem:[#allocation7 + $0x10] sm:$0xff]  ;;  %v434_v45 = vld [vmem:[%s1959_s4 + $0x18] sm:$0xff] }
  0x44   :  { %219 = vmatprep.subr.mxu0 %v1467_v0  ;;  %344 = vmatprep.subr.mxu1 %v331_v21 }
  0x45   :  { %220 = vmatpush1.msra.mxu0 %v90_v6  ;;  %345 = vmatpush1.msra.mxu1 %v330_v22 }
  0x46   :  { %221 = vmatprep.subr.mxu0 %v1467_v0  ;;  %346 = vmatprep.subr.mxu1 %v329_v23 }
  0x47   :  { %164 = vrot.lane.b32.xlu0 %v95_v1, %s1469_s26  ;;  %162 = vrot.lane.b32.xlu1 %v94_v3, %s1469_s26  ;;  %v99_v1 = vld [vmem:[#allocation2 + $0x18] sm:$0xff]  ;;  %v101_v3 = vld [vmem:[#allocation2 + $0x28] sm:$0xff] }
  0x48   :  { %222 = vmatpush1.msra.mxu0 %v89_v7  ;;  %347 = vmatpush1.msra.mxu1 %v328_v24 }
  0x49   :  { %223 = vmatprep.subr.mxu0 %v1467_v0  ;;  %348 = vmatprep.subr.mxu1 %v327_v25 }
  0x4a   :  { %224 = vmatpush1.msra.mxu0 %v88_v8  ;;  %349 = vmatpush1.msra.mxu1 %v326_v26 }
  0x4b   :  { %160 = vrot.lane.b32.xlu0 %v93_v2, %s1469_s26  ;;  %158 = vrot.lane.b32.xlu1 %v92_v4, %s1469_s26  ;;  %v98_v2 = vld [vmem:[#allocation2 + $0x10] sm:$0xff]  ;;  %v100_v4 = vld [vmem:[#allocation2 + $0x20] sm:$0xff] }
  0x4c   :  { %225 = vmatprep.subr.mxu0 %v1467_v0  ;;  %350 = vmatprep.subr.mxu1 %v325_v27 }
  0x4d   :  { %351 = vmatpush1.msra.mxu1 %v324_v28 }
  0x4e   :  { %352 = vmatprep.subr.mxu1 %v323_v29 }
  0x4f   :  { %156 = vrot.lane.b32.xlu0 %v91_v5, %s1469_s26  ;;  %154 = vrot.lane.b32.xlu1 %v90_v6, %s1469_s26  ;;  %v103_v5 = vld [vmem:[#allocation2 + $0x38] sm:$0xff]  ;;  %v102_v6 = vld [vmem:[#allocation2 + $0x30] sm:$0xff] }
  0x50   :  { %353 = vmatpush1.msra.mxu1 %v322_v30 }
  0x51   :  { %354 = vmatprep.subr.mxu1 %v321_v31 }
  0x52   :  { %355 = vmatpush1.msra.mxu1 %v320_v32 }
  0x53   :  { %152 = vrot.lane.b32.xlu0 %v89_v7, %s1469_s26  ;;  %150 = vrot.lane.b32.xlu1 %v88_v8, %s1469_s26  ;;  %v310_v7 = vld [vmem:[#allocation7 + $0x20] sm:$0xff]  ;;  %v309_v8 = vld [vmem:[#allocation7 + $0x18] sm:$0xff] }
  0x54   :  { %356 = vmatprep.subr.mxu1 %v319_v33 }
  0x55   :  { %357 = vmatpush1.msra.mxu1 %v318_v34 }
  0x56   :  { %358 = vmatprep.subr.mxu1 %v317_v35 }
  0x57   :  { %178 = vperm.xlu0 %1347, %v104_v10   ;;  %183 = vperm.xlu1 %1348, %v105_v11   ;;  %v307_v10 = vld [vmem:[#allocation7 + $0x8] sm:$0xff]  ;;  %v306_v11 = vld [vmem:[#allocation7] sm:$0xff] }
  0x58   :  { %359 = vmatpush1.msra.mxu1 %v316_v36 }
  0x59   :  { %360 = vmatprep.subr.mxu1 %v315_v37 }
  0x5a   :  { %361 = vmatpush1.msra.mxu1 %v314_v38 }
  0x5b   :  { %193 = vperm.xlu0 %1347, %v107_v16   ;;  %188 = vperm.xlu1 %1348, %v106_v17  }
  0x5c   :  { %362 = vmatprep.subr.mxu1 %v313_v39 }
  0x5d   :  { %363 = vmatpush1.msra.mxu1 %v312_v40 }
  0x5e   :  { %364 = vmatprep.subr.mxu1 %v311_v41 }
  0x5f   :  { %365 = vmatpush1.msra.mxu1 %v310_v7 }
  0x60   :  { %366 = vmatprep.subr.mxu1 %v309_v8 }
  0x61   :  { %367 = vmatpush1.msra.mxu1 %v308_v9  ;;  %v927_v9 = vld [vmem:[#allocation8 + $0x190] sm:$0xff] }
  0x62   :  { %368 = vmatprep.subr.mxu1 %v307_v10 }
  0x63   :  { %369 = vmatpush1.msra.mxu1 %v306_v11 }
  0xa9   :  { %v138_v46 = vpop.permute.xlu0 %137  ;;  %v134_v47 = vpop.permute.xlu1 %133 }
  0xaa   :  { %1219 = vmatpush1.msk.msra.mxu0 %vm1603_vm1, %v138_v46  ;;  %v433_v46 = vld [vmem:[%s1959_s4 + $0x10] sm:$0xff] }
  0xab   :  { %227 = vmatprep.subr.mxu0 %v1467_v0 }
  0xad   :  { %v136_v48 = vpop.permute.xlu0 %135  ;;  %v132_v49 = vpop.permute.xlu1 %131 }
  0xae   :  { %1221 = vmatpush1.msk.msra.mxu0 %vm1603_vm1, %v136_v48  ;;  %v431_v48 = vld [vmem:[%s1959_s4] sm:$0xff] }
  0xaf   :  { %229 = vmatprep.subr.mxu0 %v1467_v0 }
  0xb0   :  { %1223 = vmatpush1.msk.msra.mxu0 %vm1603_vm1, %v134_v47  ;;  %v432_v47 = vld [vmem:[%s1959_s4 + $0x8] sm:$0xff] }
  0xb1   :  { %231 = vmatprep.subr.mxu0 %v1467_v0  ;;  %v130_v50 = vpop.permute.xlu0 %129  ;;  %v128_v51 = vpop.permute.xlu1 %127 }
  0xb2   :  { %1225 = vmatpush1.msk.msra.mxu0 %vm1603_vm1, %v132_v49  ;;  %v435_v49 = vadd.s32 128, %v1600_v43  ;;  %v662_v43 = vld [vmem:[#allocation5 + $0x10] sm:$0xff] }
  0xb3   :  { %233 = vmatprep.subr.mxu0 %v1467_v0 }
  0xb4   :  { %1227 = vmatpush1.msk.msra.mxu0 %vm1603_vm1, %v130_v50 }
  0xb5   :  { %235 = vmatprep.subr.mxu0 %v1467_v0  ;;  %v126_v52 = vpop.permute.xlu0 %125  ;;  %v124_v53 = vpop.permute.xlu1 %123 }
  0xb6   :  { %1229 = vmatpush1.msk.msra.mxu0 %vm1603_vm1, %v128_v51  ;;  %v447_v51 = vand.u32 127, %v435_v49  ;;  %v666_v49 = vld [vmem:[%s1961_s6 + $0x10] sm:$0xff] }
  0xb7   :  { %237 = vmatprep.subr.mxu0 %v1467_v0 }
  0xb8   :  { %1231 = vmatpush1.msk.msra.mxu0 %vm1603_vm1, %v126_v52  ;;  %vm1711_vm7 = vcmp.ne.s32.totalorder %v447_v51, 127  ;;  %vm1751_vm10 = vcmp.ne.s32.totalorder %v447_v51, 0  ;;  %v937_v51 = vld [vmem:[#allocation8 + $0x1e0] sm:$0xff] }
  0xb9   :  { %239 = vmatprep.subr.mxu0 %v1467_v0  ;;  %v165_v54 = vpop.permute.xlu0 %164  ;;  %v163_v56 = vpop.permute.xlu1 %162 }
  0xba   :  { %1233 = vmatpush1.msk.msra.mxu0 %vm1603_vm1, %v124_v53 }
  0xbb   :  { %257 = vmatprep.subr.mxu0 %v1467_v0 }
  0xbc   :  { %1235 = vmatpush2.msk.msra.mxu0 %vm1628_vm2, %v165_v54 }
  0xbd   :  { %259 = vmatprep.subr.mxu0 %v1467_v0  ;;  %v161_v57 = vpop.permute.xlu0 %160  ;;  %v159_v58 = vpop.permute.xlu1 %158 }
  0xbe   :  { %1237 = vmatpush2.msk.msra.mxu0 %vm1628_vm2, %v163_v56 }
  0xbf   :  { %261 = vmatprep.subr.mxu0 %v1467_v0 }
  0xc0   :  { %1239 = vmatpush2.msk.msra.mxu0 %vm1628_vm2, %v161_v57 }
  0xc1   :  { %263 = vmatprep.subr.mxu0 %v1467_v0  ;;  %v157_v59 = vpop.permute.xlu0 %156  ;;  %v155_v60 = vpop.permute.xlu1 %154 }
  0xc2   :  { %1241 = vmatpush2.msk.msra.mxu0 %vm1628_vm2, %v159_v58 }
  0xc3   :  { %265 = vmatprep.subr.mxu0 %v1467_v0 }
  0xc4   :  { %1243 = vmatpush2.msk.msra.mxu0 %vm1628_vm2, %v157_v59 }
  0xc5   :  { %267 = vmatprep.subr.mxu0 %v1467_v0  ;;  %v153_v61 = vpop.permute.xlu0 %152  ;;  %v151_v62 = vpop.permute.xlu1 %150 }
  0xc6   :  { %1245 = vmatpush2.msk.msra.mxu0 %vm1628_vm2, %v155_v60 }
  0xc7   :  { %269 = vmatprep.subr.mxu0 %v1467_v0 }
  0xc8   :  { %1247 = vmatpush2.msk.msra.mxu0 %vm1628_vm2, %v153_v61 }
  0xc9   :  { %271 = vmatprep.subr.mxu0 %v1467_v0 }
  0xca   :  { %1249 = vmatpush2.msk.msra.mxu0 %vm1628_vm2, %v151_v62 }
  0xcb   :  { %274 = vmatmul.mubr.f32.vlgmr.msra.gmra.mxu0 %v96_v63 }
  0xcc   :  { %1251 = vmatprep.mubr.msk.f32.mxu0 %vm196_vm0, %v99_v1 }
  0xcf   :  { %279 = vmatmul.mubr.f32.gmra.mxu0 %v98_v2 }
  0xd0   :  { %1252 = vmatprep.mubr.msk.f32.mxu0 %vm196_vm0, %v101_v3 }
  0xd2   :  { %v179_v12 = vpop.permute.xlu0 %178  ;;  %v184_v15 = vpop.permute.xlu1 %183 }
  0xd3   :  { %284 = vmatmul.mubr.f32.gmra.mxu0 %v100_v4 }
  0xd4   :  { %1253 = vmatprep.mubr.msk.f32.mxu0 %vm196_vm0, %v103_v5 }
  0xd6   :  { %v189_v23 = vpop.permute.xlu1 %188  ;;  %v194_v29 = vpop.permute.xlu0 %193 }
  0xd7   :  { %289 = vmatmul.mubr.f32.gmra.mxu0 %v102_v6 }
  0xd8   :  { %828 = vmatprep.mubr.f32.mxu0 %v1467_v0 }
 0x18b   :  { %v275_v13 = vpop.f32.mrf.mxu0 }
 0x18c   :  { %v276_v14 = vadd.f32 %v275_v13, %v179_v12 }
 0x18d   :  { %v277_v16 = vpop.f32.mrf.mxu0 }
 0x18e   :  { %v298_v17 = vmul.f32 0.2, %v276_v14  ;;  %vm294_vm3 = vcmp.gt.f32.partialorder %v276_v14, 0.0 }
 0x18f   :  { %v280_v18 = vpop.f32.mrf.mxu0 }
 0x190   :  { %v281_v19 = vadd.f32 %v280_v18, %v184_v15  ;;  %v302_v20 = vsel %vm294_vm3, %v276_v14, %v298_v17 }
 0x191   :  { %v282_v21 = vpop.f32.mrf.mxu0  ;;  %403 = vmatmul.mubr.f32.vlgmr.msra.gmra.mxu1 %v302_v20 }
 0x192   :  { %v299_v22 = vmul.f32 0.2, %v281_v19  ;;  %408 = vmatprep.mubr.f32.mxu1 %v1467_v0  ;;  %vm295_vm4 = vcmp.gt.f32.partialorder %v281_v19, 0.0 }
 0x193   :  { %v285_v24 = vpop.f32.mrf.mxu0 }
 0x194   :  { %v286_v25 = vadd.f32 %v285_v24, %v189_v23  ;;  %v303_v26 = vsel %vm295_vm4, %v281_v19, %v299_v22  ;;  %v427_v22 = vld [vmem:[%s1958_s3] sm:$0xff]  ;;  %v428_v23 = vld [vmem:[%s1958_s3 + $0x8] sm:$0xff]  ;;  %v429_v24 = vld [vmem:[%s1958_s3 + $0x10] sm:$0xff] }
 0x195   :  { %v287_v27 = vpop.f32.mrf.mxu0  ;;  %409 = vmatmul.mubr.f32.gmra.mxu1 %v303_v26 }
 0x196   :  { %v300_v28 = vmul.f32 0.2, %v286_v25  ;;  %414 = vmatprep.mubr.f32.mxu1 %v1467_v0  ;;  %vm296_vm5 = vcmp.gt.f32.partialorder %v286_v25, 0.0 }
 0x197   :  { %v290_v30 = vpop.f32.mrf.mxu0 }
 0x198   :  { %v291_v31 = vadd.f32 %v290_v30, %v194_v29  ;;  %v304_v32 = vsel %vm296_vm5, %v286_v25, %v300_v28  ;;  %v430_v25 = vld [vmem:[%s1958_s3 + $0x18] sm:$0xff] }
 0x199   :  { %v292_v33 = vpop.f32.mrf.mxu0  ;;  %415 = vmatmul.mubr.f32.gmra.mxu1 %v304_v32 }
 0x19a   :  { %v301_v34 = vmul.f32 0.2, %v291_v31  ;;  %420 = vmatprep.mubr.f32.mxu1 %v1467_v0  ;;  %vm297_vm6 = vcmp.gt.f32.partialorder %v291_v31, 0.0 }
 0x19c   :  { %v305_v35 = vsel %vm297_vm6, %v291_v31, %v301_v34 }
 0x19d   :  { %421 = vmatmul.mubr.f32.gmra.mxu1 %v305_v35 }
 0x19e   :  { %635 = vmatprep.mubr.f32.mxu1 %v1467_v0 }
 0x251   :  { %v1666_v36 = vpop.f32.mrf.mxu1 }
 0x253   :  { %v1668_v37 = vpop.f32.mrf.mxu1 }
 0x255   :  { %v1670_v38 = vpop.f32.mrf.mxu1 }
 0x257   :  { %v1672_v39 = vpop.f32.mrf.mxu1 }
 0x259   :  { %v416_v40 = vpop.f32.mrf.mxu1 }
 0x25a   :  { %505 = vrot.lane.b32.xlu1 %v416_v40, %s1469_s26 }
 0x25b   :  { %v418_v41 = vpop.f32.mrf.mxu1 }
 0x25c   :  { %513 = vrot.lane.b32.xlu0 %v418_v41, %s1469_s26 }
 0x25d   :  { %v422_v42 = vpop.f32.mrf.mxu1 }
 0x25e   :  { %507 = vrot.lane.b32.xlu1 %v422_v42, %s1469_s26 }
 0x25f   :  { %v424_v44 = vpop.f32.mrf.mxu1 }
 0x260   :  { %515 = vrot.lane.b32.xlu0 %v424_v44, %s1469_s26 }
 0x262   :  { %503 = vrot.lane.b32.xlu1 %v1670_v38, %s1469_s26 }
 0x264   :  { %511 = vrot.lane.b32.xlu0 %v1672_v39, %s1469_s26 }
 0x266   :  { %501 = vrot.lane.b32.xlu1 %v1666_v36, %s1469_s26 }
 0x268   :  { %509 = vrot.lane.b32.xlu0 %v1668_v37, %s1469_s26 }
 0x26a   :  { %468 = vrot.lane.b32.xlu1 %v422_v42, %s1468_s8 }
 0x26c   :  { %474 = vrot.lane.b32.xlu0 %v418_v41, %s1468_s8 }
 0x26e   :  { %466 = vrot.lane.b32.xlu1 %v416_v40, %s1468_s8 }
 0x270   :  { %476 = vrot.lane.b32.xlu0 %v424_v44, %s1468_s8 }
 0x272   :  { %464 = vrot.lane.b32.xlu1 %v1670_v38, %s1468_s8 }
 0x274   :  { %472 = vrot.lane.b32.xlu0 %v1672_v39, %s1468_s8 }
 0x276   :  { %462 = vrot.lane.b32.xlu1 %v1666_v36, %s1468_s8 }
 0x278   :  { %470 = vrot.lane.b32.xlu0 %v1668_v37, %s1468_s8 }
 0x27a   :  { %555 = vperm.xlu1 %1348, %v434_v45  }
 0x27c   :  { %550 = vperm.xlu0 %1347, %v433_v46  }
 0x27e   :  { %545 = vperm.xlu1 %1348, %v432_v47   ;;  %v664_v47 = vld [vmem:[%s1961_s6] sm:$0xff] }
 0x280   :  { %540 = vperm.xlu0 %1347, %v431_v48   ;;  %v665_v48 = vld [vmem:[%s1961_s6 + $0x8] sm:$0xff] }
 0x2cc   :  { %v506_v50 = vpop.permute.xlu1 %505 }
 0x2ce   :  { %v514_v52 = vpop.permute.xlu0 %513 }
 0x2cf   :  { %v524_v59 = vsel %vm517_vm8, %v514_v52, %v506_v50  ;;  %v520_v60 = vsel %vm517_vm8, %v506_v50, %v514_v52  ;;  %v938_v50 = vld [vmem:[#allocation8 + $0x1e8] sm:$0xff] }
 0x2d0   :  { %v508_v53 = vpop.permute.xlu1 %507  ;;  %v934_v52 = vld [vmem:[#allocation8 + $0x1c8] sm:$0xff] }
 0x2d2   :  { %v516_v55 = vpop.permute.xlu0 %515 }
 0x2d3   :  { %v521_v56 = vsel %vm517_vm8, %v508_v53, %v516_v55  ;;  %v525_v57 = vsel %vm517_vm8, %v516_v55, %v508_v53  ;;  %v667_v53 = vld [vmem:[%s1961_s6 + $0x18] sm:$0xff]  ;;  %v933_v55 = vld [vmem:[#allocation8 + $0x1c0] sm:$0xff]  ;;  %s1471_s6 = smov [#allocation10]  }
 0x2d4   :  { %v504_v58 = vpop.permute.xlu1 %503  ;;  %1255 = vmatprep.subr.msk.mxu1 %vm1711_vm7, %v525_v57  ;;  %v929_v57 = vld [vmem:[#allocation8 + $0x1a0] sm:$0xff] }
 0x2d5   :  { %1257 = vmatpush1.msk.msra.mxu1 %vm1329_vm9, %v521_v56  ;;  %v930_v56 = vld [vmem:[#allocation8 + $0x1a8] sm:$0xff] }
 0x2d6   :  { %1259 = vmatprep.subr.msk.mxu1 %vm1711_vm7, %v524_v59  ;;  %v512_v61 = vpop.permute.xlu0 %511  ;;  %v925_v59 = vld [vmem:[#allocation8 + $0x180] sm:$0xff] }
 0x2d7   :  { %v519_v62 = vsel %vm517_vm8, %v504_v58, %v512_v61  ;;  %v523_v63 = vsel %vm517_vm8, %v512_v61, %v504_v58  ;;  %1261 = vmatpush1.msk.msra.mxu1 %vm1329_vm9, %v520_v60  ;;  %v926_v58 = vld [vmem:[#allocation8 + $0x188] sm:$0xff]  ;;  %v921_v61 = vld [vmem:[#allocation8 + $0x160] sm:$0xff] }
 0x2d8   :  { %v502_v1 = vpop.permute.xlu1 %501  ;;  %1263 = vmatprep.subr.msk.mxu1 %vm1711_vm7, %v523_v63  ;;  %v922_v60 = vld [vmem:[#allocation8 + $0x168] sm:$0xff]  ;;  %v917_v63 = vld [vmem:[#allocation8 + $0x140] sm:$0xff] }
 0x2d9   :  { %1265 = vmatpush1.msk.msra.mxu1 %vm1329_vm9, %v519_v62  ;;  %v918_v62 = vld [vmem:[#allocation8 + $0x148] sm:$0xff] }
 0x2da   :  { %v510_v2 = vpop.permute.xlu0 %509 }
 0x2db   :  { %v518_v3 = vsel %vm517_vm8, %v502_v1, %v510_v2  ;;  %v522_v4 = vsel %vm517_vm8, %v510_v2, %v502_v1  ;;  %v914_v1 = vld [vmem:[#allocation8 + $0x128] sm:$0xff]  ;;  %v913_v2 = vld [vmem:[#allocation8 + $0x120] sm:$0xff] }
 0x2dc   :  { %v469_v5 = vpop.permute.xlu1 %468  ;;  %1267 = vmatprep.subr.msk.mxu1 %vm1711_vm7, %v522_v4  ;;  %v909_v4 = vld [vmem:[#allocation8 + $0x100] sm:$0xff] }
 0x2dd   :  { %1269 = vmatpush1.msk.msra.mxu1 %vm1329_vm9, %v518_v3  ;;  %v910_v3 = vld [vmem:[#allocation8 + $0x108] sm:$0xff] }
 0x2de   :  { %587 = vmatprep.subr.mxu1 %v424_v44  ;;  %v475_v6 = vpop.permute.xlu0 %474 }
 0x2df   :  { %588 = vmatpush1.msra.mxu1 %v422_v42 }
 0x2e0   :  { %v467_v7 = vpop.permute.xlu1 %466  ;;  %589 = vmatprep.subr.mxu1 %v418_v41 }
 0x2e1   :  { %590 = vmatpush1.msra.mxu1 %v416_v40  ;;  %v481_v14 = vsel %vm478_vm11, %v467_v7, %v475_v6  ;;  %v485_v15 = vsel %vm478_vm11, %v475_v6, %v467_v7  ;;  %v905_v6 = vld [vmem:[#allocation8 + $0xe0] sm:$0xff]  ;;  %v902_v7 = vld [vmem:[#allocation8 + $0xc8] sm:$0xff] }
 0x2e2   :  { %591 = vmatprep.subr.mxu1 %v1672_v39  ;;  %v477_v8 = vpop.permute.xlu0 %476 }
 0x2e3   :  { %592 = vmatpush1.msra.mxu1 %v1670_v38  ;;  %v482_v11 = vsel %vm478_vm11, %v469_v5, %v477_v8  ;;  %v486_v12 = vsel %vm478_vm11, %v477_v8, %v469_v5  ;;  %v906_v5 = vld [vmem:[#allocation8 + $0xe8] sm:$0xff]  ;;  %v901_v8 = vld [vmem:[#allocation8 + $0xc0] sm:$0xff] }
 0x2e4   :  { %v465_v10 = vpop.permute.xlu1 %464  ;;  %593 = vmatprep.subr.mxu1 %v1668_v37 }
 0x2e5   :  { %594 = vmatpush1.msra.mxu1 %v1666_v36 }
 0x2e6   :  { %1271 = vmatprep.subr.msk.mxu1 %vm1751_vm10, %v482_v11  ;;  %v473_v13 = vpop.permute.xlu0 %472  ;;  %v897_v11 = vld [vmem:[#allocation8 + $0xa0] sm:$0xff] }
 0x2e7   :  { %1273 = vmatpush1.msk.msra.mxu1 %vm1331_vm12, %v486_v12  ;;  %v480_v16 = vsel %vm478_vm11, %v465_v10, %v473_v13  ;;  %v484_v17 = vsel %vm478_vm11, %v473_v13, %v465_v10  ;;  %v898_v10 = vld [vmem:[#allocation8 + $0xa8] sm:$0xff]  ;;  %v893_v13 = vld [vmem:[#allocation8 + $0x80] sm:$0xff] }
 0x2e8   :  { %1275 = vmatprep.subr.msk.mxu1 %vm1751_vm10, %v481_v14  ;;  %v463_v18 = vpop.permute.xlu1 %462  ;;  %v894_v12 = vld [vmem:[#allocation8 + $0x88] sm:$0xff] }
 0x2e9   :  { %1277 = vmatpush1.msk.msra.mxu1 %vm1331_vm12, %v485_v15  ;;  %v890_v14 = vld [vmem:[#allocation8 + $0x68] sm:$0xff]  ;;  %v889_v15 = vld [vmem:[#allocation8 + $0x60] sm:$0xff] }
 0x2ea   :  { %1279 = vmatprep.subr.msk.mxu1 %vm1751_vm10, %v480_v16  ;;  %v471_v19 = vpop.permute.xlu0 %470  ;;  %v886_v16 = vld [vmem:[#allocation8 + $0x48] sm:$0xff] }
 0x2eb   :  { %v479_v20 = vsel %vm478_vm11, %v463_v18, %v471_v19  ;;  %v483_v21 = vsel %vm478_vm11, %v471_v19, %v463_v18  ;;  %1281 = vmatpush1.msk.msra.mxu1 %vm1331_vm12, %v484_v17  ;;  %v885_v17 = vld [vmem:[#allocation8 + $0x40] sm:$0xff]  ;;  %v882_v18 = vld [vmem:[#allocation8 + $0x28] sm:$0xff] }
 0x2ec   :  { %1283 = vmatprep.subr.msk.mxu1 %vm1751_vm10, %v479_v20  ;;  %v881_v19 = vld [vmem:[#allocation8 + $0x20] sm:$0xff]  ;;  %v878_v20 = vld [vmem:[#allocation8 + $0x8] sm:$0xff] }
 0x2ed   :  { %1285 = vmatpush1.msk.msra.mxu1 %vm1331_vm12, %v483_v21  ;;  %v877_v21 = vld [vmem:[#allocation8] sm:$0xff] }
 0x2ee   :  { %1286 = vmatmul.mubr.msk.f32.vlgmr.msra.gmra.mxu1 %vm558_vm13, %v427_v22  ;;  %1005 = vmatprep.subr.mxu1 %v938_v50  ;;  %v1002_v22 = vld [vmem:[#allocation8 + $0x3e8] sm:$0xff]  ;;  %v965_v50 = vld [vmem:[#allocation8 + $0x2c0] sm:$0xff] }
 0x2ef   :  { %641 = vmatprep.mubr.f32.mxu1 %v1467_v0  ;;  %1006 = vmatpush1.msra.mxu1 %v937_v51  ;;  %v962_v51 = vld [vmem:[#allocation8 + $0x2a8] sm:$0xff] }
 0x2f0   :  { %1007 = vmatprep.subr.mxu1 %v934_v52  ;;  %v961_v52 = vld [vmem:[#allocation8 + $0x2a0] sm:$0xff] }
 0x2f1   :  { %1008 = vmatpush1.msra.mxu1 %v933_v55 }
 0x2f2   :  { %1287 = vmatmul.mubr.msk.f32.gmra.mxu1 %vm558_vm13, %v428_v23  ;;  %1009 = vmatprep.subr.mxu1 %v930_v56  ;;  %v1001_v23 = vld [vmem:[#allocation8 + $0x3e0] sm:$0xff] }
 0x2f3   :  { %647 = vmatprep.mubr.f32.mxu1 %v1467_v0  ;;  %1010 = vmatpush1.msra.mxu1 %v929_v57 }
 0x2f4   :  { %1011 = vmatprep.subr.mxu1 %v926_v58 }
 0x2f5   :  { %v556_v33 = vpop.permute.xlu1 %555  ;;  %1012 = vmatpush1.msra.mxu1 %v925_v59 }
 0x2f6   :  { %1288 = vmatmul.mubr.msk.f32.gmra.mxu1 %vm558_vm13, %v429_v24  ;;  %1013 = vmatprep.subr.mxu1 %v922_v60  ;;  %v998_v24 = vld [vmem:[#allocation8 + $0x3c8] sm:$0xff] }
 0x2f7   :  { %653 = vmatprep.mubr.f32.mxu1 %v1467_v0  ;;  %v551_v30 = vpop.permute.xlu0 %550  ;;  %1014 = vmatpush1.msra.mxu1 %v921_v61 }
 0x2f8   :  { %1015 = vmatprep.subr.mxu1 %v918_v62 }
 0x2f9   :  { %v546_v40 = vpop.permute.xlu1 %545  ;;  %1016 = vmatpush1.msra.mxu1 %v917_v63 }
 0x2fa   :  { %1289 = vmatmul.mubr.msk.f32.gmra.mxu1 %vm558_vm13, %v430_v25  ;;  %1017 = vmatprep.subr.mxu1 %v914_v1  ;;  %v997_v25 = vld [vmem:[#allocation8 + $0x3c0] sm:$0xff] }
 0x2fb   :  { %v541_v44 = vpop.permute.xlu0 %540  ;;  %1018 = vmatpush1.msra.mxu1 %v913_v2 }
 0x2fc   :  { %1019 = vmatprep.subr.mxu1 %v910_v3 }
 0x2fd   :  { %1020 = vmatpush1.msra.mxu1 %v909_v4 }
 0x2fe   :  { %1021 = vmatprep.subr.mxu1 %v906_v5 }
 0x2ff   :  { %1022 = vmatpush1.msra.mxu1 %v905_v6 }
 0x300   :  { %1023 = vmatprep.subr.mxu1 %v902_v7 }
 0x301   :  { %1024 = vmatpush1.msra.mxu1 %v901_v8 }
 0x302   :  { %1025 = vmatprep.subr.mxu1 %v898_v10 }
 0x303   :  { %1026 = vmatpush1.msra.mxu1 %v897_v11 }
 0x304   :  { %1027 = vmatprep.subr.mxu1 %v894_v12 }
 0x305   :  { %1028 = vmatpush1.msra.mxu1 %v893_v13 }
 0x306   :  { %1029 = vmatprep.subr.mxu1 %v890_v14 }
 0x307   :  { %1030 = vmatpush1.msra.mxu1 %v889_v15 }
 0x308   :  { %1031 = vmatprep.subr.mxu1 %v886_v16  ;;  %v660_v16 = vld [vmem:[#allocation5] sm:$0xff] }
 0x309   :  { %1032 = vmatpush1.msra.mxu1 %v885_v17  ;;  %v940_v17 = vld [vmem:[#allocation8 + $0x1f8] sm:$0xff] }
 0x30a   :  { %1033 = vmatprep.subr.mxu1 %v882_v18  ;;  %v939_v18 = vld [vmem:[#allocation8 + $0x1f0] sm:$0xff] }
 0x30b   :  { %1034 = vmatpush1.msra.mxu1 %v881_v19  ;;  %v936_v19 = vld [vmem:[#allocation8 + $0x1d8] sm:$0xff] }
 0x30c   :  { %1035 = vmatprep.subr.mxu1 %v878_v20  ;;  %v935_v20 = vld [vmem:[#allocation8 + $0x1d0] sm:$0xff] }
 0x30d   :  { %1036 = vmatpush1.msra.mxu1 %v877_v21  ;;  %v661_v21 = vld [vmem:[#allocation5 + $0x8] sm:$0xff] }
 0x30e   :  { %1037 = vmatprep.subr.mxu1 %v1002_v22  ;;  %v932_v22 = vld [vmem:[#allocation8 + $0x1b8] sm:$0xff] }
 0x30f   :  { %1038 = vmatpush2.msra.mxu1 %v1001_v23  ;;  %v931_v23 = vld [vmem:[#allocation8 + $0x1b0] sm:$0xff] }
 0x310   :  { %1039 = vmatprep.subr.mxu1 %v998_v24  ;;  %v928_v24 = vld [vmem:[#allocation8 + $0x198] sm:$0xff] }
 0x311   :  { %1040 = vmatpush2.msra.mxu1 %v997_v25  ;;  %v924_v25 = vld [vmem:[#allocation8 + $0x178] sm:$0xff] }
 0x3ae   :  { %v637_v26 = vpop.f32.mrf.mxu1 }
 0x3af   :  { %v1832_v45 = vadd.f32 %v637_v26, %v541_v44  ;;  %v994_v26 = vld [vmem:[#allocation8 + $0x3a8] sm:$0xff] }
 0x3b0   :  { %v639_v27 = vpop.f32.mrf.mxu1  ;;  %1041 = vmatprep.subr.mxu1 %v994_v26  ;;  %v923_v26 = vld [vmem:[#allocation8 + $0x170] sm:$0xff] }
 0x3b1   :  { %v1836_v46 = vadd.f32 %v639_v27, %v541_v44  ;;  %v993_v27 = vld [vmem:[#allocation8 + $0x3a0] sm:$0xff] }
 0x3b2   :  { %v643_v28 = vpop.f32.mrf.mxu1  ;;  %1042 = vmatpush2.msra.mxu1 %v993_v27  ;;  %v973_v44 = vld [vmem:[#allocation8 + $0x300] sm:$0xff]  ;;  %v920_v27 = vld [vmem:[#allocation8 + $0x158] sm:$0xff] }
 0x3b3   :  { %v1824_v41 = vadd.f32 %v643_v28, %v546_v40  ;;  %v990_v28 = vld [vmem:[#allocation8 + $0x388] sm:$0xff] }
 0x3b4   :  { %v645_v29 = vpop.f32.mrf.mxu1  ;;  %1043 = vmatprep.subr.mxu1 %v990_v28  ;;  %v919_v28 = vld [vmem:[#allocation8 + $0x150] sm:$0xff] }
 0x3b5   :  { %v1828_v42 = vadd.f32 %v645_v29, %v546_v40  ;;  %v989_v29 = vld [vmem:[#allocation8 + $0x380] sm:$0xff]  ;;  %v974_v40 = vld [vmem:[#allocation8 + $0x308] sm:$0xff] }
 0x3b6   :  { %v649_v31 = vpop.f32.mrf.mxu1  ;;  %1044 = vmatpush2.msra.mxu1 %v989_v29  ;;  %v663_v29 = vld [vmem:[#allocation5 + $0x18] sm:$0xff] }
 0x3b7   :  { %v1810_v32 = vadd.f32 %v649_v31, %v551_v30  ;;  %v985_v31 = vld [vmem:[#allocation8 + $0x360] sm:$0xff] }
 0x3b8   :  { %v651_v34 = vpop.f32.mrf.mxu1 }
 0x3b9   :  { %v1812_v35 = vadd.f32 %v651_v34, %v551_v30  ;;  %704 = vrot.lane.b32.xlu1 %v1810_v32, %s1469_s26  ;;  %v986_v30 = vld [vmem:[#allocation8 + $0x368] sm:$0xff]  ;;  %v981_v34 = vld [vmem:[#allocation8 + $0x340] sm:$0xff] }
 0x3ba   :  { %v655_v36 = vpop.f32.mrf.mxu1  ;;  %1045 = vmatprep.subr.mxu1 %v986_v30  ;;  %v916_v30 = vld [vmem:[#allocation8 + $0x138] sm:$0xff] }
 0x3bb   :  { %v1816_v37 = vadd.f32 %v655_v36, %v556_v33  ;;  %712 = vrot.lane.b32.xlu0 %v1812_v35, %s1469_s26  ;;  %1046 = vmatpush2.msra.mxu1 %v985_v31  ;;  %v978_v36 = vld [vmem:[#allocation8 + $0x328] sm:$0xff]  ;;  %v915_v31 = vld [vmem:[#allocation8 + $0x130] sm:$0xff] }
 0x3bc   :  { %v657_v38 = vpop.f32.mrf.mxu1 }
 0x3bd   :  { %v1820_v39 = vadd.f32 %v657_v38, %v556_v33  ;;  %706 = vrot.lane.b32.xlu1 %v1816_v37, %s1469_s26  ;;  %v982_v33 = vld [vmem:[#allocation8 + $0x348] sm:$0xff]  ;;  %v977_v38 = vld [vmem:[#allocation8 + $0x320] sm:$0xff] }
 0x3be   :  { %1047 = vmatprep.subr.mxu1 %v982_v33  ;;  %v912_v33 = vld [vmem:[#allocation8 + $0x118] sm:$0xff] }
 0x3bf   :  { %714 = vrot.lane.b32.xlu0 %v1820_v39, %s1469_s26  ;;  %1048 = vmatpush2.msra.mxu1 %v981_v34  ;;  %v911_v34 = vld [vmem:[#allocation8 + $0x110] sm:$0xff] }
 0x3c0   :  { %1049 = vmatprep.subr.mxu1 %v978_v36  ;;  %v908_v36 = vld [vmem:[#allocation8 + $0xf8] sm:$0xff] }
 0x3c1   :  { %702 = vrot.lane.b32.xlu1 %v1824_v41, %s1469_s26  ;;  %1050 = vmatpush2.msra.mxu1 %v977_v38  ;;  %v907_v38 = vld [vmem:[#allocation8 + $0xf0] sm:$0xff] }
 0x3c2   :  { %1051 = vmatprep.subr.mxu1 %v974_v40  ;;  %v904_v40 = vld [vmem:[#allocation8 + $0xd8] sm:$0xff] }
 0x3c3   :  { %710 = vrot.lane.b32.xlu0 %v1828_v42, %s1469_s26  ;;  %1052 = vmatpush2.msra.mxu1 %v973_v44  ;;  %v903_v44 = vld [vmem:[#allocation8 + $0xd0] sm:$0xff] }
 0x3c5   :  { %700 = vrot.lane.b32.xlu1 %v1832_v45, %s1469_s26 }
 0x3c7   :  { %708 = vrot.lane.b32.xlu0 %v1836_v46, %s1469_s26 }
 0x3c9   :  { %674 = vrot.lane.b32.xlu1 %v1816_v37, %s1468_s8 }
 0x3cb   :  { %680 = vrot.lane.b32.xlu0 %v1812_v35, %s1468_s8 }
 0x3cd   :  { %672 = vrot.lane.b32.xlu1 %v1810_v32, %s1468_s8 }
 0x3cf   :  { %682 = vrot.lane.b32.xlu0 %v1820_v39, %s1468_s8 }
 0x3d1   :  { %670 = vrot.lane.b32.xlu1 %v1824_v41, %s1468_s8 }
 0x3d3   :  { %678 = vrot.lane.b32.xlu0 %v1828_v42, %s1468_s8 }
 0x3d5   :  { %668 = vrot.lane.b32.xlu1 %v1832_v45, %s1468_s8 }
 0x3d7   :  { %676 = vrot.lane.b32.xlu0 %v1836_v46, %s1468_s8  ;;  %s1204_s8 = sshll.u32 %s1471_s6, 4  ;;  %s1205_s8 = int_to_ptr.vmem [resolvable:$true] %s1204_s8 }
 0x3d8   :  { %s1429_s7 = scalar_lea.vmem %s1205_s8, 2048  ;;  %p1434_p7 = scmp.lt.s32.totalorder %s1205_s8, %s1205_s8 }
 0x3d9   :  { %734 = vperm.xlu1 %1348, %v664_v47   ;;  %v970_v47 = vld [vmem:[#allocation8 + $0x2e8] sm:$0xff]  ;;  %p1430_p6 = scmp.ne.s32.totalorder %s1205_s8, %s1429_s7  ;;  %p1435_p8 = scmp.lt.s32.totalorder %s1429_s7, %s1429_s7 }
 0x3da   :  { %1053 = vmatprep.subr.mxu1 %v970_v47  ;;  %v899_v47 = vld [vmem:[#allocation8 + $0xb0] sm:$0xff] }
 0x3db   :  { %739 = vperm.xlu0 %1347, %v665_v48   ;;  %v969_v48 = vld [vmem:[#allocation8 + $0x2e0] sm:$0xff]  ;;  %p1436_p9 = por %p1435_p8, %p1434_p7 }
 0x3dc   :  { %1054 = vmatpush2.msra.mxu1 %v969_v48  ;;  %v896_v48 = vld [vmem:[#allocation8 + $0x98] sm:$0xff] }
 0x3dd   :  { %744 = vperm.xlu1 %1348, %v666_v49   ;;  %v966_v49 = vld [vmem:[#allocation8 + $0x2c8] sm:$0xff]  ;;  %p1437_p10 = pnand %p1436_p9, %p1430_p6 }
 0x3de   :  { %1055 = vmatprep.subr.mxu1 %v966_v49  ;;  %v895_v49 = vld [vmem:[#allocation8 + $0x90] sm:$0xff] }
 0x3df   :  { %749 = vperm.xlu0 %1347, %v667_v53   ;;  %1056 = vmatpush2.msra.mxu1 %v965_v50  ;;  %v958_v53 = vld [vmem:[#allocation8 + $0x288] sm:$0xff]  ;;  %v892_v50 = vld [vmem:[#allocation8 + $0x78] sm:$0xff] }
 0x3e0   :  { %1057 = vmatprep.subr.mxu1 %v962_v51  ;;  %v891_v51 = vld [vmem:[#allocation8 + $0x70] sm:$0xff] }
 0x3e1   :  { %1058 = vmatpush2.msra.mxu1 %v961_v52  ;;  %v888_v52 = vld [vmem:[#allocation8 + $0x58] sm:$0xff] }
 0x3e2   :  { %1059 = vmatprep.subr.mxu1 %v958_v53  ;;  %v887_v53 = vld [vmem:[#allocation8 + $0x50] sm:$0xff] }
 0x42b   :  { %v705_v55 = vpop.permute.xlu1 %704 }
 0x42d   :  { %v713_v56 = vpop.permute.xlu0 %712 }
 0x42e   :  { %v722_v62 = vsel %vm517_vm8, %v713_v56, %v705_v55  ;;  %v718_v63 = vsel %vm517_vm8, %v705_v55, %v713_v56  ;;  %v884_v55 = vld [vmem:[#allocation8 + $0x38] sm:$0xff]  ;;  %v883_v56 = vld [vmem:[#allocation8 + $0x30] sm:$0xff] }
 0x42f   :  { %v707_v57 = vpop.permute.xlu1 %706 }
 0x431   :  { %v715_v58 = vpop.permute.xlu0 %714 }
 0x432   :  { %v719_v59 = vsel %vm517_vm8, %v707_v57, %v715_v58  ;;  %v723_v60 = vsel %vm517_vm8, %v715_v58, %v707_v57  ;;  %v880_v57 = vld [vmem:[#allocation8 + $0x18] sm:$0xff]  ;;  %v879_v58 = vld [vmem:[#allocation8 + $0x10] sm:$0xff] }
 0x433   :  { %v703_v61 = vpop.permute.xlu1 %702  ;;  %1291 = vmatprep.subr.msk.mxu0 %vm1711_vm7, %v723_v60  ;;  %v1003_v60 = vld [vmem:[#allocation8 + $0x3f0] sm:$0xff] }
 0x434   :  { %1293 = vmatpush1.msk.msra.mxu0 %vm1329_vm9, %v719_v59  ;;  %v1004_v59 = vld [vmem:[#allocation8 + $0x3f8] sm:$0xff] }
 0x435   :  { %1295 = vmatprep.subr.msk.mxu0 %vm1711_vm7, %v722_v62  ;;  %v711_v1 = vpop.permute.xlu0 %710  ;;  %v999_v62 = vld [vmem:[#allocation8 + $0x3d0] sm:$0xff] }
 0x436   :  { %v717_v2 = vsel %vm517_vm8, %v703_v61, %v711_v1  ;;  %v721_v3 = vsel %vm517_vm8, %v711_v1, %v703_v61  ;;  %1297 = vmatpush1.msk.msra.mxu0 %vm1329_vm9, %v718_v63  ;;  %v1000_v61 = vld [vmem:[#allocation8 + $0x3d8] sm:$0xff]  ;;  %v995_v1 = vld [vmem:[#allocation8 + $0x3b0] sm:$0xff] }
 0x437   :  { %v701_v4 = vpop.permute.xlu1 %700  ;;  %1299 = vmatprep.subr.msk.mxu0 %vm1711_vm7, %v721_v3  ;;  %v996_v63 = vld [vmem:[#allocation8 + $0x3b8] sm:$0xff]  ;;  %v991_v3 = vld [vmem:[#allocation8 + $0x390] sm:$0xff] }
 0x438   :  { %1301 = vmatpush1.msk.msra.mxu0 %vm1329_vm9, %v717_v2  ;;  %v992_v2 = vld [vmem:[#allocation8 + $0x398] sm:$0xff] }
 0x439   :  { %v709_v5 = vpop.permute.xlu0 %708 }
 0x43a   :  { %v716_v6 = vsel %vm517_vm8, %v701_v4, %v709_v5  ;;  %v720_v7 = vsel %vm517_vm8, %v709_v5, %v701_v4  ;;  %v988_v4 = vld [vmem:[#allocation8 + $0x378] sm:$0xff]  ;;  %v987_v5 = vld [vmem:[#allocation8 + $0x370] sm:$0xff] }
 0x43b   :  { %v675_v8 = vpop.permute.xlu1 %674  ;;  %1303 = vmatprep.subr.msk.mxu0 %vm1711_vm7, %v720_v7  ;;  %v983_v7 = vld [vmem:[#allocation8 + $0x350] sm:$0xff] }
 0x43c   :  { %1305 = vmatpush1.msk.msra.mxu0 %vm1329_vm9, %v716_v6  ;;  %v984_v6 = vld [vmem:[#allocation8 + $0x358] sm:$0xff] }
 0x43d   :  { %780 = vmatprep.subr.mxu0 %v1820_v39  ;;  %v681_v10 = vpop.permute.xlu0 %680 }
 0x43e   :  { %781 = vmatpush1.msra.mxu0 %v1816_v37 }
 0x43f   :  { %v673_v11 = vpop.permute.xlu1 %672  ;;  %782 = vmatprep.subr.mxu0 %v1812_v35 }
 0x440   :  { %783 = vmatpush1.msra.mxu0 %v1810_v32  ;;  %v686_v35 = vsel %vm478_vm11, %v673_v11, %v681_v10  ;;  %v690_v39 = vsel %vm478_vm11, %v681_v10, %v673_v11  ;;  %v979_v10 = vld [vmem:[#allocation8 + $0x330] sm:$0xff]  ;;  %v976_v11 = vld [vmem:[#allocation8 + $0x318] sm:$0xff] }
 0x441   :  { %784 = vmatprep.subr.mxu0 %v1828_v42  ;;  %v683_v12 = vpop.permute.xlu0 %682 }
 0x442   :  { %785 = vmatpush1.msra.mxu0 %v1824_v41  ;;  %v687_v13 = vsel %vm478_vm11, %v675_v8, %v683_v12  ;;  %v691_v37 = vsel %vm478_vm11, %v683_v12, %v675_v8  ;;  %v980_v8 = vld [vmem:[#allocation8 + $0x338] sm:$0xff]  ;;  %v975_v12 = vld [vmem:[#allocation8 + $0x310] sm:$0xff] }
 0x443   :  { %v671_v54 = vpop.permute.xlu1 %670  ;;  %786 = vmatprep.subr.mxu0 %v1836_v46 }
 0x444   :  { %787 = vmatpush1.msra.mxu0 %v1832_v45 }
 0x445   :  { %1307 = vmatprep.subr.msk.mxu0 %vm1751_vm10, %v687_v13  ;;  %v679_v32 = vpop.permute.xlu0 %678  ;;  %v971_v13 = vld [vmem:[#allocation8 + $0x2f0] sm:$0xff] }
 0x446   :  { %1309 = vmatpush1.msk.msra.mxu0 %vm1331_vm12, %v691_v37  ;;  %v685_v41 = vsel %vm478_vm11, %v671_v54, %v679_v32  ;;  %v689_v42 = vsel %vm478_vm11, %v679_v32, %v671_v54  ;;  %v972_v54 = vld [vmem:[#allocation8 + $0x2f8] sm:$0xff]  ;;  %v967_v32 = vld [vmem:[#allocation8 + $0x2d0] sm:$0xff] }
 0x447   :  { %1311 = vmatprep.subr.msk.mxu0 %vm1751_vm10, %v686_v35  ;;  %v669_v45 = vpop.permute.xlu1 %668  ;;  %v968_v37 = vld [vmem:[#allocation8 + $0x2d8] sm:$0xff] }
 0x448   :  { %1313 = vmatpush1.msk.msra.mxu0 %vm1331_vm12, %v690_v39  ;;  %v964_v35 = vld [vmem:[#allocation8 + $0x2b8] sm:$0xff]  ;;  %v963_v39 = vld [vmem:[#allocation8 + $0x2b0] sm:$0xff] }
 0x449   :  { %1315 = vmatprep.subr.msk.mxu0 %vm1751_vm10, %v685_v41  ;;  %v677_v46 = vpop.permute.xlu0 %676  ;;  %v960_v41 = vld [vmem:[#allocation8 + $0x298] sm:$0xff] }
 0x44a   :  { %v684_v14 = vsel %vm478_vm11, %v669_v45, %v677_v46  ;;  %v688_v15 = vsel %vm478_vm11, %v677_v46, %v669_v45  ;;  %1317 = vmatpush1.msk.msra.mxu0 %vm1331_vm12, %v689_v42  ;;  %v957_v42 = vld [vmem:[#allocation8 + $0x280] sm:$0xff]  ;;  %v959_v45 = vld [vmem:[#allocation8 + $0x290] sm:$0xff]  ;;  %v954_v46 = vld [vmem:[#allocation8 + $0x268] sm:$0xff] }
 0x44b   :  { %1319 = vmatprep.subr.msk.mxu0 %vm1751_vm10, %v684_v14  ;;  %1060 = vmatpush2.msra.mxu1 %v957_v42  ;;  %v956_v14 = vld [vmem:[#allocation8 + $0x278] sm:$0xff] }
 0x44c   :  { %1321 = vmatpush1.msk.msra.mxu0 %vm1331_vm12, %v688_v15  ;;  %1061 = vmatprep.subr.mxu1 %v954_v46  ;;  %v953_v15 = vld [vmem:[#allocation8 + $0x260] sm:$0xff] }
 0x44d   :  { %1322 = vmatmul.mubr.msk.f32.vlgmr.msra.gmra.mxu0 %vm558_vm13, %v660_v16  ;;  %1094 = vmatprep.subr.mxu0 %v940_v17  ;;  %v955_v16 = vld [vmem:[#allocation8 + $0x270] sm:$0xff]  ;;  %v950_v17 = vld [vmem:[#allocation8 + $0x248] sm:$0xff] }
 0x44e   :  { %834 = vmatprep.mubr.f32.mxu0 %v1467_v0  ;;  %1095 = vmatpush1.msra.mxu0 %v939_v18  ;;  %v952_v18 = vld [vmem:[#allocation8 + $0x258] sm:$0xff] }
 0x44f   :  { %1096 = vmatprep.subr.mxu0 %v936_v19  ;;  %1062 = vmatpush2.msra.mxu1 %v953_v15  ;;  %v949_v19 = vld [vmem:[#allocation8 + $0x240] sm:$0xff] }
 0x450   :  { %1097 = vmatpush1.msra.mxu0 %v935_v20  ;;  %1063 = vmatprep.subr.mxu1 %v950_v17  ;;  %v951_v20 = vld [vmem:[#allocation8 + $0x250] sm:$0xff] }
 0x451   :  { %1323 = vmatmul.mubr.msk.f32.gmra.mxu0 %vm558_vm13, %v661_v21  ;;  %1098 = vmatprep.subr.mxu0 %v932_v22  ;;  %v946_v21 = vld [vmem:[#allocation8 + $0x228] sm:$0xff]  ;;  %v948_v22 = vld [vmem:[#allocation8 + $0x238] sm:$0xff] }
 0x452   :  { %840 = vmatprep.mubr.f32.mxu0 %v1467_v0  ;;  %1099 = vmatpush1.msra.mxu0 %v931_v23  ;;  %v945_v23 = vld [vmem:[#allocation8 + $0x220] sm:$0xff] }
 0x453   :  { %1100 = vmatprep.subr.mxu0 %v928_v24  ;;  %1064 = vmatpush2.msra.mxu1 %v949_v19  ;;  %v947_v24 = vld [vmem:[#allocation8 + $0x230] sm:$0xff] }
 0x454   :  { %1101 = vmatpush1.msra.mxu0 %v927_v9  ;;  %1065 = vmatprep.subr.mxu1 %v946_v21  ;;  %v942_v9 = vld [vmem:[#allocation8 + $0x208] sm:$0xff] }
 0x455   :  { %1324 = vmatmul.mubr.msk.f32.gmra.mxu0 %vm558_vm13, %v662_v43  ;;  %1102 = vmatprep.subr.mxu0 %v924_v25  ;;  %v944_v43 = vld [vmem:[#allocation8 + $0x218] sm:$0xff]  ;;  %v941_v25 = vld [vmem:[#allocation8 + $0x200] sm:$0xff] }
 0x456   :  { %846 = vmatprep.mubr.f32.mxu0 %v1467_v0  ;;  %1103 = vmatpush1.msra.mxu0 %v923_v26  ;;  %v900_v0 = vld [vmem:[#allocation8 + $0xb8] sm:$0xff]  ;;  %v943_v26 = vld [vmem:[#allocation8 + $0x210] sm:$0xff] }
 0x457   :  { %1104 = vmatprep.subr.mxu0 %v920_v27  ;;  %1066 = vmatpush2.msra.mxu1 %v945_v23  ;;  %v735_v27 = vpop.permute.xlu1 %734 }
 0x458   :  { %1105 = vmatpush1.msra.mxu0 %v919_v28  ;;  %1067 = vmatprep.subr.mxu1 %v942_v9 }
 0x459   :  { %1325 = vmatmul.mubr.msk.f32.gmra.mxu0 %vm558_vm13, %v663_v29  ;;  %1106 = vmatprep.subr.mxu0 %v916_v30 }
 0x45a   :  { %1107 = vmatpush1.msra.mxu0 %v915_v31  ;;  %1068 = vmatpush2.msra.mxu1 %v941_v25 }
 0x45b   :  { %1108 = vmatprep.subr.mxu0 %v912_v33  ;;  %v740_v33 = vpop.permute.xlu0 %739 }
 0x45c   :  { %1109 = vmatpush1.msra.mxu0 %v911_v34 }
 0x45d   :  { %1110 = vmatprep.subr.mxu0 %v908_v36 }
 0x45e   :  { %1111 = vmatpush1.msra.mxu0 %v907_v38 }
 0x45f   :  { %1112 = vmatprep.subr.mxu0 %v904_v40 }
 0x460   :  { %1113 = vmatpush1.msra.mxu0 %v903_v44 }
 0x461   :  { %1114 = vmatprep.subr.mxu0 %v900_v0 }
 0x462   :  { %1115 = vmatpush1.msra.mxu0 %v899_v47 }
 0x463   :  { %1116 = vmatprep.subr.mxu0 %v896_v48  ;;  %v745_v48 = vpop.permute.xlu1 %744 }
 0x464   :  { %1117 = vmatpush1.msra.mxu0 %v895_v49 }
 0x465   :  { %1118 = vmatprep.subr.mxu0 %v892_v50 }
 0x466   :  { %1119 = vmatpush1.msra.mxu0 %v891_v51 }
 0x467   :  { %1120 = vmatprep.subr.mxu0 %v888_v52 }
 0x468   :  { %1121 = vmatpush1.msra.mxu0 %v887_v53 }
 0x469   :  { %1122 = vmatprep.subr.mxu0 %v884_v55 }
 0x46a   :  { %1123 = vmatpush1.msra.mxu0 %v883_v56 }
 0x46b   :  { %1124 = vmatprep.subr.mxu0 %v880_v57 }
 0x46c   :  { %1125 = vmatpush1.msra.mxu0 %v879_v58  ;;  %v750_v58 = vpop.permute.xlu0 %749 }
 0x46d   :  { %1126 = vmatprep.subr.mxu0 %v1004_v59 }
 0x46e   :  { %1127 = vmatpush2.msra.mxu0 %v1003_v60 }
 0x46f   :  { %1128 = vmatprep.subr.mxu0 %v1000_v61 }
 0x470   :  { %1129 = vmatpush2.msra.mxu0 %v999_v62 }
 0x471   :  { %1130 = vmatprep.subr.mxu0 %v996_v63 }
 0x472   :  { %1131 = vmatpush2.msra.mxu0 %v995_v1 }
 0x473   :  { %1132 = vmatprep.subr.mxu0 %v992_v2 }
 0x474   :  { %1133 = vmatpush2.msra.mxu0 %v991_v3 }
 0x475   :  { %1134 = vmatprep.subr.mxu0 %v988_v4 }
 0x476   :  { %1135 = vmatpush2.msra.mxu0 %v987_v5 }
 0x477   :  { %1136 = vmatprep.subr.mxu0 %v984_v6 }
 0x478   :  { %1137 = vmatpush2.msra.mxu0 %v983_v7 }
 0x479   :  { %1138 = vmatprep.subr.mxu0 %v980_v8 }
 0x47a   :  { %1139 = vmatpush2.msra.mxu0 %v979_v10 }
 0x47b   :  { %1140 = vmatprep.subr.mxu0 %v976_v11 }
 0x47c   :  { %1141 = vmatpush2.msra.mxu0 %v975_v12 }
 0x47d   :  { %1142 = vmatprep.subr.mxu0 %v972_v54 }
 0x47e   :  { %1143 = vmatpush2.msra.mxu0 %v971_v13 }
 0x47f   :  { %1144 = vmatprep.subr.mxu0 %v968_v37 }
 0x480   :  { %1145 = vmatpush2.msra.mxu0 %v967_v32 }
 0x481   :  { %1146 = vmatprep.subr.mxu0 %v964_v35 }
 0x482   :  { %1147 = vmatpush2.msra.mxu0 %v963_v39 }
 0x483   :  { %1148 = vmatprep.subr.mxu0 %v960_v41 }
 0x484   :  { %1149 = vmatpush2.msra.mxu0 %v959_v45 }
 0x485   :  { %1150 = vmatprep.subr.mxu0 %v956_v14 }
 0x486   :  { %1151 = vmatpush2.msra.mxu0 %v955_v16 }
 0x487   :  { %1152 = vmatprep.subr.mxu0 %v952_v18 }
 0x488   :  { %1153 = vmatpush2.msra.mxu0 %v951_v20 }
 0x489   :  { %1154 = vmatprep.subr.mxu0 %v948_v22 }
 0x48a   :  { %1155 = vmatpush2.msra.mxu0 %v947_v24 }
 0x48b   :  { %1156 = vmatprep.subr.mxu0 %v944_v43 }
 0x48c   :  { %1157 = vmatpush2.msra.mxu0 %v943_v26 }
 0x50d   :  { %v830_v28 = vpop.f32.mrf.mxu0 }
 0x50e   :  { %v831_v29 = vadd.f32 %v830_v28, %v735_v27 }
 0x50f   :  { %v832_v30 = vpop.f32.mrf.mxu0 }
 0x510   :  { %v833_v31 = vadd.f32 %v832_v30, %v735_v27  ;;  %v861_v34 = vmul.f32 0.2, %v831_v29  ;;  %vm853_vm14 = vcmp.gt.f32.partialorder %v831_v29, 0.0 }
 0x511   :  { %v836_v36 = vpop.f32.mrf.mxu0 }
 0x512   :  { %v862_v38 = vmul.f32 0.2, %v833_v31  ;;  %v837_v40 = vadd.f32 %v836_v36, %v740_v33  ;;  %vm854_vm15 = vcmp.gt.f32.partialorder %v833_v31, 0.0  ;;  %v869_v49 = vsel %vm853_vm14, %v831_v29, %v861_v34 }
 0x513   :  { %v838_v44 = vpop.f32.mrf.mxu0 }
 0x514   :  { %v839_v0 = vadd.f32 %v838_v44, %v740_v33  ;;  %v870_v47 = vsel %vm854_vm15, %v833_v31, %v862_v38  ;;  %v863_v50 = vmul.f32 0.2, %v837_v40  ;;  %vm855_vm1 = vcmp.gt.f32.partialorder %v837_v40, 0.0 }
 0x515   :  { %v842_v51 = vpop.f32.mrf.mxu0  ;;  %1069 = vmatprep.mubr.f32.mxu1 %v870_v47  ;;  %1158 = vmatprep.mubr.f32.mxu0 %v870_v47 }
 0x516   :  { %v864_v52 = vmul.f32 0.2, %v839_v0  ;;  %v843_v53 = vadd.f32 %v842_v51, %v745_v48  ;;  %1070 = vmatmul.mubr.f32.vlgmr.msra.gmra.mxu1 %v869_v49  ;;  %1159 = vmatmul.mubr.f32.vlgmr.msra.gmra.mxu0 %v869_v49  ;;  %vm856_vm0 = vcmp.gt.f32.partialorder %v839_v0, 0.0  ;;  %v871_v61 = vsel %vm855_vm1, %v837_v40, %v863_v50 }
 0x517   :  { %v844_v55 = vpop.f32.mrf.mxu0 }
 0x518   :  { %v845_v56 = vadd.f32 %v844_v55, %v745_v48  ;;  %v872_v57 = vsel %vm856_vm0, %v839_v0, %v864_v52  ;;  %v865_v59 = vmul.f32 0.2, %v843_v53  ;;  %vm857_vm3 = vcmp.gt.f32.partialorder %v843_v53, 0.0 }
 0x519   :  { %v848_v60 = vpop.f32.mrf.mxu0  ;;  %1075 = vmatprep.mubr.f32.mxu1 %v872_v57  ;;  %1164 = vmatprep.mubr.f32.mxu0 %v872_v57 }
 0x51a   :  { %v866_v62 = vmul.f32 0.2, %v845_v56  ;;  %v849_v63 = vadd.f32 %v848_v60, %v750_v58  ;;  %1076 = vmatmul.mubr.f32.gmra.mxu1 %v871_v61  ;;  %1165 = vmatmul.mubr.f32.gmra.mxu0 %v871_v61  ;;  %vm858_vm2 = vcmp.gt.f32.partialorder %v845_v56, 0.0  ;;  %v873_v5 = vsel %vm857_vm3, %v843_v53, %v865_v59 }
 0x51b   :  { %v850_v1 = vpop.f32.mrf.mxu0 }
 0x51c   :  { %v851_v2 = vadd.f32 %v850_v1, %v750_v58  ;;  %v874_v3 = vsel %vm858_vm2, %v845_v56, %v866_v62  ;;  %v867_v4 = vmul.f32 0.2, %v849_v63  ;;  %vm859_vm5 = vcmp.gt.f32.partialorder %v849_v63, 0.0 }
 0x51d   :  { %1081 = vmatprep.mubr.f32.mxu1 %v874_v3  ;;  %1170 = vmatprep.mubr.f32.mxu0 %v874_v3 }
 0x51e   :  { %v868_v6 = vmul.f32 0.2, %v851_v2  ;;  %1082 = vmatmul.mubr.f32.gmra.mxu1 %v873_v5  ;;  %1171 = vmatmul.mubr.f32.gmra.mxu0 %v873_v5  ;;  %vm860_vm4 = vcmp.gt.f32.partialorder %v851_v2, 0.0  ;;  %v875_v8 = vsel %vm859_vm5, %v849_v63, %v867_v4 }
 0x520   :  { %v876_v7 = vsel %vm860_vm4, %v851_v2, %v868_v6 }
 0x521   :  { %1087 = vmatprep.mubr.f32.mxu1 %v876_v7  ;;  %1176 = vmatprep.mubr.f32.mxu0 %v876_v7 }
 0x522   :  { %1088 = vmatmul.mubr.f32.gmra.mxu1 %v875_v8  ;;  %1177 = vmatmul.mubr.f32.gmra.mxu0 %v875_v8 }
 0x5d6   :  { %v1071_v10 = vpop.f32.mrf.mxu1  ;;  %v1160_v11 = vpop.f32.mrf.mxu0 }
 0x5d7   :  { %1183 = vst [vmem:[#allocation10] sm:$0xff] %v1071_v10  ;;  %1185 = vst [vmem:[#allocation10 + $0x10] sm:$0xff] %v1160_v11 }
 0x5d8   :  { %v1073_v12 = vpop.f32.mrf.mxu1  ;;  %v1162_v54 = vpop.f32.mrf.mxu0 }
 0x5d9   :  { %1184 = vst [vmem:[#allocation10 + $0x8] sm:$0xff] %v1073_v12  ;;  %1186 = vst [vmem:[#allocation10 + $0x18] sm:$0xff] %v1162_v54 }
 0x5da   :  { %v1077_v13 = vpop.f32.mrf.mxu1  ;;  %v1166_v37 = vpop.f32.mrf.mxu0 }
 0x5db   :  { %1187 = vst [vmem:[#allocation10 + $0x20] sm:$0xff] %v1077_v13  ;;  %1189 = vst [vmem:[#allocation10 + $0x30] sm:$0xff] %v1166_v37 }
 0x5dc   :  { %v1079_v32 = vpop.f32.mrf.mxu1  ;;  %v1168_v35 = vpop.f32.mrf.mxu0 }
 0x5dd   :  { %1188 = vst [vmem:[#allocation10 + $0x28] sm:$0xff] %v1079_v32  ;;  %1190 = vst [vmem:[#allocation10 + $0x38] sm:$0xff] %v1168_v35 }
 0x5de   :  { %v1083_v39 = vpop.f32.mrf.mxu1  ;;  %v1172_v41 = vpop.f32.mrf.mxu0 }
 0x5df   :  { %1191 = vst [vmem:[#allocation10 + $0x40] sm:$0xff] %v1083_v39  ;;  %1193 = vst [vmem:[#allocation10 + $0x50] sm:$0xff] %v1172_v41 }
 0x5e0   :  { %v1085_v42 = vpop.f32.mrf.mxu1  ;;  %v1174_v45 = vpop.f32.mrf.mxu0 }
 0x5e1   :  { %1192 = vst [vmem:[#allocation10 + $0x48] sm:$0xff] %v1085_v42  ;;  %1194 = vst [vmem:[#allocation10 + $0x58] sm:$0xff] %v1174_v45 }
 0x5e2   :  { %v1089_v46 = vpop.f32.mrf.mxu1  ;;  %v1178_v14 = vpop.f32.mrf.mxu0 }
 0x5e3   :  { %1195 = vst [vmem:[#allocation10 + $0x60] sm:$0xff] %v1089_v46  ;;  %1197 = vst [vmem:[#allocation10 + $0x70] sm:$0xff] %v1178_v14 }
 0x5e4   :  { %v1091_v15 = vpop.f32.mrf.mxu1  ;;  %v1180_v16 = vpop.f32.mrf.mxu0 }
 0x5e5   :  { %1196 = vst [vmem:[#allocation10 + $0x68] sm:$0xff] %v1091_v15  ;;  %1198 = vst [vmem:[#allocation10 + $0x78] sm:$0xff] %v1180_v16 }
 0x5e6   :  { %1440 = shalt.err (!%p1437_p10)
}
 0x5e7   :  { %1210 = dma.vmem_to_hbm [thread:$0]  %s1205_s8, 2048, %s1964_s9, [#allocation4], %s1465_s1, %s1465_s1, %s1466_s30  }
 0x5e8   :  { %1455 = dma.done.wait [#allocation4], 2048  }
 0x5e9   :  { %1456 = vsyncadd [#allocation4], 4294965248 }
 0x5ea   :  { %1214 = vsyncpa [#allocation3], 1 }
 0x5eb   :  { %1215 = vsyncpa [#allocation6], 1 }
 0x5ec   :  { %1216 = vsyncpa [#allocation9], 1 }
 0x5ed   :  { %1217 = vsyncpa [#allocation4], 1 }

</bundles_post_ra>
